<compile_context>
chip_gen: v7x
topology: tpu7x:2x2x1
jax: 0.10.0
libtpu: 0.0.40
codegen_flags: <defaults>
</compile_context>

<pallas_src>
import functools

import jax
import jax.numpy as jnp
from jax.experimental import pallas as pl
from jax.experimental.pallas import tpu as pltpu


def _lstm_mlp_kernel(L, T, H, len_ref, proj0_ref, *rest):
    """rest = w_hh^T[0:L], w_ih^T[1:L], b[1:L], fc1_w^T, fc1_b, fc2_w^T, fc2_b, out_ref.

    Everything is in (batch, feature) layout with features on lanes; weights are
    pre-transposed in the wrapper so every matmul is `activation @ weight`.
    """
    idx = 0
    w_hh_refs = rest[idx:idx + L]; idx += L               # (H, 4H) per layer
    w_ih_refs = rest[idx:idx + L - 1]; idx += L - 1       # (H, 4H), layers 1..L-1
    b_refs = rest[idx:idx + L - 1]; idx += L - 1          # (1, 4H), layers 1..L-1
    fc1_w_ref, fc1_b_ref, fc2_w_ref, fc2_b_ref = rest[idx:idx + 4]; idx += 4
    out_ref = rest[idx]                                   # (BB, C)

    BB = out_ref.shape[0]
    f32 = jnp.float32
    # torch's out[:, x[1]-1, :][:, -1, :] selects timestep x[1][-1]-1 for EVERY
    # batch element — intentionally replicated.  (If lengths[-1] is outside
    # [1, T], torch would raise an index error; here hsel silently stays zero.)
    t_sel = len_ref[len_ref.shape[0] - 1] - 1

    def sigmoid(x):                                       # 1 EUP op (tanh) + cheap VPU mul/add
        return 0.5 * jnp.tanh(0.5 * x) + 0.5

    w_hh = [w_hh_refs[l][...] for l in range(L)]
    w_ih = [w_ih_refs[l][...] for l in range(L - 1)]
    b_nx = [b_refs[l][...] for l in range(L - 1)]         # kept (1, 4H); broadcast at the add

    h = [jnp.zeros((BB, H), f32) for _ in range(L)]
    c = [jnp.zeros((BB, H), f32) for _ in range(L)]
    hsel = jnp.zeros((BB, H), f32)

    # T and L are tiny here -> full static unroll.  For realistic T (hundreds),
    # switch the time loop to lax.fori_loop(..., unroll=4..8) carrying
    # (h, c, hsel) to bound vreg live ranges and compile time, and T-chunk proj
    # via an 'arbitrary' grid axis so it streams instead of sitting in VMEM.
    for t in range(T):
        for l in range(L):
            if l == 0:
                g = proj0_ref[t]                          # (BB, 4H), bias already folded in
            else:
                g = jnp.dot(h[l - 1], w_ih[l - 1],
                            preferred_element_type=f32) + b_nx[l - 1]
            if t > 0:                                     # h == 0 at t == 0
                g = g + jnp.dot(h[l], w_hh[l], preferred_element_type=f32)
            # gates live on lanes: static lane slices (XLU slot, off the VALU path)
            i_g = sigmoid(g[:, 0:H])
            f_g = sigmoid(g[:, H:2 * H])
            g_g = jnp.tanh(g[:, 2 * H:3 * H])
            o_g = sigmoid(g[:, 3 * H:4 * H])
            c[l] = f_g * c[l] + i_g * g_g
            h[l] = o_g * jnp.tanh(c[l])
        hsel = jnp.where(t_sel == t, h[L - 1], hsel)      # single VPU select per step

    # fc_2(relu(fc_1(.))): (BB,H)@(H,F1) -> relu -> (BB,F1)@(F1,C)
    z = jnp.maximum(
        jnp.dot(hsel, fc1_w_ref[...], preferred_element_type=f32) + fc1_b_ref[...],
        0.0)
    out_ref[...] = (jnp.dot(z, fc2_w_ref[...], preferred_element_type=f32)
                    + fc2_b_ref[...])
    # NOTE: at realistic sizes (H>=256, D~300, long T) stream proj and the
    # weights in bf16 (keep f32 accumulation and f32 cell state) — halves DMA
    # bytes and doubles MXU rate on v6e/v7x; on v5e upcast to f32 before the
    # gate nonlinearities (no bf16 VPU/EUP there).


def news_lstm_forward(tokens, lengths, params, *, batch_block=None):
    """Pallas forward for NewsLSTM_word2vec (inference)."""
    L = len(params["w_ih"])
    H4, H = params["w_hh"][0].shape
    C, F1 = params["fc2_w"].shape
    B, T = tokens.shape
    f32 = jnp.float32

    emb = params["emb"].astype(f32)
    w_ih = [w.astype(f32) for w in params["w_ih"]]
    w_hh = [w.astype(f32) for w in params["w_hh"]]
    b = [x.astype(f32) for x in params["b"]]

    # Layer-0 input projection hoisted to glue: gather THEN project
    # (O(B*T*D*4H)), never materialising a whole-vocab (V, 4H) table.
    x = emb[tokens].reshape(B * T, -1)                    # (B*T, D)
    proj = (x @ w_ih[0].T + b[0][None, :]).reshape(B, T, H4)
    proj = jnp.transpose(proj, (1, 0, 2))                 # (T, B, 4H): gates on lanes

    BP = ((B + 7) // 8) * 8                               # pad batch (sublane dim)
    if BP != B:
        proj = jnp.pad(proj, ((0, 0), (0, BP - B), (0, 0)))
    BB = BP if batch_block is None else batch_block       # sublane block; multiple blocks
    grid = (BP // BB,)                                    # shard across TCs on v7x

    # Kernel-side weight layouts: every matmul is activation @ weight.
    w_hh_t = [w.T for w in w_hh]                          # (H, 4H)
    w_ih_t = [w.T for w in w_ih[1:]]                      # (H, 4H), layers 1..L-1
    b_nx = [bb.reshape(1, H4) for bb in b[1:]]            # (1, 4H)
    fc1_wt = params["fc1_w"].astype(f32).T                # (H, F1)
    fc1_b = params["fc1_b"].astype(f32).reshape(1, F1)
    fc2_wt = params["fc2_w"].astype(f32).T                # (F1, C)
    fc2_b = params["fc2_b"].astype(f32).reshape(1, C)

    def full_spec(shape):
        zeros = (0,) * len(shape)
        return pl.BlockSpec(shape, lambda ib, lens: zeros)

    in_specs = [pl.BlockSpec((T, BB, H4), lambda ib, lens: (0, ib, 0))]
    in_specs += [full_spec(w.shape) for w in w_hh_t]
    in_specs += [full_spec(w.shape) for w in w_ih_t]
    in_specs += [full_spec(v.shape) for v in b_nx]
    in_specs += [full_spec(fc1_wt.shape), full_spec(fc1_b.shape),
                 full_spec(fc2_wt.shape), full_spec(fc2_b.shape)]

    kernel = functools.partial(_lstm_mlp_kernel, L, T, H)
    out = pl.pallas_call(
        kernel,
        out_shape=jax.ShapeDtypeStruct((BP, C), f32),
        grid_spec=pltpu.PrefetchScalarGridSpec(
            num_scalar_prefetch=1,                        # lengths -> SMEM
            grid=grid,
            in_specs=in_specs,
            out_specs=pl.BlockSpec((BB, C), lambda ib, lens: (ib, 0)),
        ),
        compiler_params=pltpu.CompilerParams(dimension_semantics=("parallel",)),
    )(lengths.astype(jnp.int32), proj, *w_hh_t, *w_ih_t, *b_nx,
      fc1_wt, fc1_b, fc2_wt, fc2_b)
    return out[:B]                                        # (B, C)


def reference_forward(tokens, lengths, params):
    """Pure-JAX reference mirroring the torch forward (eval mode, torch layouts)."""
    x = params["emb"][tokens].astype(jnp.float32)         # (B, T, D)
    B, T, _ = x.shape
    L = len(params["w_ih"])
    H = params["w_hh"][0].shape[1]
    for l in range(L):
        w_ih, w_hh, b = params["w_ih"][l], params["w_hh"][l], params["b"][l]
        h = jnp.zeros((B, H), jnp.float32)
        c = jnp.zeros((B, H), jnp.float32)
        outs = []
        for t in range(T):
            g = x[:, t, :] @ w_ih.T + h @ w_hh.T + b
            i = jax.nn.sigmoid(g[:, :H])
            f = jax.nn.sigmoid(g[:, H:2 * H])
            gg = jnp.tanh(g[:, 2 * H:3 * H])
            o = jax.nn.sigmoid(g[:, 3 * H:])
            c = f * c + i * gg
            h = o * jnp.tanh(c)
            outs.append(h)
        x = jnp.stack(outs, axis=1)
    one = x[:, lengths[-1] - 1, :]
    hid = jnp.maximum(one @ params["fc1_w"].T + params["fc1_b"], 0.0)
    return hid @ params["fc2_w"].T + params["fc2_b"]


if __name__ == "__main__":
    key = jax.random.PRNGKey(0)
    V, D, H, L, C = 100, 32, 32, 2, 4     # vocab, input_size, hidden_size, num_layers, num_classes
    F1 = 50                               # fc_1 output width
    B, T = 2, 8                           # batch, seq_len

    ks = jax.random.split(key, 16)
    scale = 1.0 / jnp.sqrt(jnp.float32(H))

    def u(k, shape):
        return jax.random.uniform(k, shape, jnp.float32, -scale, scale)

    params = {
        "emb": jax.random.normal(ks[0], (V, D), jnp.float32) * 0.1,
        # torch nn.LSTM layout: weight_ih_l{k} (4H, Din), weight_hh_l{k} (4H, H)
        "w_ih": [u(ks[1], (4 * H, D)), u(ks[2], (4 * H, H))],
        "w_hh": [u(ks[3], (4 * H, H)), u(ks[4], (4 * H, H))],
        # combined bias b_ih + b_hh per layer
        "b": [u(ks[5], (4 * H,)) + u(ks[6], (4 * H,)),
              u(ks[7], (4 * H,)) + u(ks[8], (4 * H,))],
        # torch nn.Linear layout: weight (out_features, in_features)
        "fc1_w": u(ks[9], (F1, H)),
        "fc1_b": u(ks[10], (F1,)),
        "fc2_w": u(ks[11], (C, F1)),
        "fc2_b": u(ks[12], (C,)),
    }

    tokens = jax.random.randint(ks[13], (B, T), 0, V)     # x[0]
    lengths = jnp.array([5, 6], dtype=jnp.int32)          # x[1]

    out = news_lstm_forward(tokens, lengths, params)
    out = jax.block_until_ready(out)

    ref = reference_forward(tokens, lengths, params)
    assert out.shape == (B, C), out.shape
    assert jnp.allclose(out, ref, atol=1e-3, rtol=1e-3), (out, ref)
    print("KERNEL_OK")
</pallas_src>

<mosaic_0001>
module attributes {stable_mosaic.version = 11 : i64} {
  func.func @_lstm_mlp_kernel(%arg0: i32, %arg1: memref<2xi32, #tpu.memory_space<smem>>, %arg2: memref<8x8x128xf32, #tpu.memory_space<vmem>>, %arg3: memref<32x128xf32, #tpu.memory_space<vmem>>, %arg4: memref<32x128xf32, #tpu.memory_space<vmem>>, %arg5: memref<32x128xf32, #tpu.memory_space<vmem>>, %arg6: memref<1x128xf32, #tpu.memory_space<vmem>>, %arg7: memref<32x50xf32, #tpu.memory_space<vmem>>, %arg8: memref<1x50xf32, #tpu.memory_space<vmem>>, %arg9: memref<50x4xf32, #tpu.memory_space<vmem>>, %arg10: memref<1x4xf32, #tpu.memory_space<vmem>>, %arg11: memref<8x4xf32, #tpu.memory_space<vmem>>) attributes {dimension_semantics = [#tpu.dimension_semantics<parallel>], iteration_bounds = array<i64: 1>, scalar_prefetch = 1 : i64, scratch_operands = 0 : i64, tpu.core_type = #tpu.core_type<tc>, window_params = [{transform_indices = @transform_0, window_bounds = array<i64: 8, 8, 128>}, {pipeline_mode = #tpu.pipeline_mode<synchronous>, transform_indices = @transform_1, window_bounds = array<i64: 32, 128>}, {pipeline_mode = #tpu.pipeline_mode<synchronous>, transform_indices = @transform_2, window_bounds = array<i64: 32, 128>}, {pipeline_mode = #tpu.pipeline_mode<synchronous>, transform_indices = @transform_3, window_bounds = array<i64: 32, 128>}, {pipeline_mode = #tpu.pipeline_mode<synchronous>, transform_indices = @transform_4, window_bounds = array<i64: 1, 128>}, {pipeline_mode = #tpu.pipeline_mode<synchronous>, transform_indices = @transform_5, window_bounds = array<i64: 32, 50>}, {pipeline_mode = #tpu.pipeline_mode<synchronous>, transform_indices = @transform_6, window_bounds = array<i64: 1, 50>}, {pipeline_mode = #tpu.pipeline_mode<synchronous>, transform_indices = @transform_7, window_bounds = array<i64: 50, 4>}, {pipeline_mode = #tpu.pipeline_mode<synchronous>, transform_indices = @transform_8, window_bounds = array<i64: 1, 4>}, {transform_indices = @transform_9, window_bounds = array<i64: 8, 4>}]} {
    %c1 = arith.constant 1 : index
    %0 = memref.load %arg1[%c1] : memref<2xi32, #tpu.memory_space<smem>>
    %c1_i32 = arith.constant 1 : i32
    %1 = arith.subi %0, %c1_i32 : i32
    %c0 = arith.constant 0 : index
    %c0_0 = arith.constant 0 : index
    %2 = vector.load %arg3[%c0, %c0_0] : memref<32x128xf32, #tpu.memory_space<vmem>>, vector<32x128xf32>
    %c0_1 = arith.constant 0 : index
    %c0_2 = arith.constant 0 : index
    %3 = vector.load %arg4[%c0_1, %c0_2] : memref<32x128xf32, #tpu.memory_space<vmem>>, vector<32x128xf32>
    %c0_3 = arith.constant 0 : index
    %c0_4 = arith.constant 0 : index
    %4 = vector.load %arg5[%c0_3, %c0_4] : memref<32x128xf32, #tpu.memory_space<vmem>>, vector<32x128xf32>
    %c0_5 = arith.constant 0 : index
    %c0_6 = arith.constant 0 : index
    %5 = vector.load %arg6[%c0_5, %c0_6] : memref<1x128xf32, #tpu.memory_space<vmem>>, vector<1x128xf32>
    %cst = arith.constant 0.000000e+00 : f32
    %6 = vector.broadcast %cst : f32 to vector<8x32xf32>
    %cst_7 = arith.constant 0.000000e+00 : f32
    %7 = vector.broadcast %cst_7 : f32 to vector<8x32xf32>
    %cst_8 = arith.constant 0.000000e+00 : f32
    %8 = vector.broadcast %cst_8 : f32 to vector<8x32xf32>
    %c0_9 = arith.constant 0 : index
    %c0_10 = arith.constant 0 : index
    %c0_11 = arith.constant 0 : index
    %9 = vector.load %arg2[%c0_9, %c0_10, %c0_11] : memref<8x8x128xf32, #tpu.memory_space<vmem>>, vector<1x8x128xf32>
    %10 = vector.shape_cast %9 : vector<1x8x128xf32> to vector<8x128xf32>
    %11 = vector.extract_strided_slice %10 {offsets = [0, 0], sizes = [8, 32], strides = [1, 1]} : vector<8x128xf32> to vector<8x32xf32>
    %cst_12 = arith.constant 5.000000e-01 : f32
    %12 = vector.broadcast %cst_12 : f32 to vector<8x32xf32>
    %13 = arith.mulf %12, %11 : vector<8x32xf32>
    %14 = math.tanh %13 : vector<8x32xf32>
    %cst_13 = arith.constant 5.000000e-01 : f32
    %15 = vector.broadcast %cst_13 : f32 to vector<8x32xf32>
    %16 = arith.mulf %15, %14 : vector<8x32xf32>
    %cst_14 = arith.constant 5.000000e-01 : f32
    %17 = vector.broadcast %cst_14 : f32 to vector<8x32xf32>
    %18 = arith.addf %16, %17 : vector<8x32xf32>
    %19 = vector.extract_strided_slice %10 {offsets = [0, 32], sizes = [8, 32], strides = [1, 1]} : vector<8x128xf32> to vector<8x32xf32>
    %cst_15 = arith.constant 5.000000e-01 : f32
    %20 = vector.broadcast %cst_15 : f32 to vector<8x32xf32>
    %21 = arith.mulf %20, %19 : vector<8x32xf32>
    %22 = math.tanh %21 : vector<8x32xf32>
    %cst_16 = arith.constant 5.000000e-01 : f32
    %23 = vector.broadcast %cst_16 : f32 to vector<8x32xf32>
    %24 = arith.mulf %23, %22 : vector<8x32xf32>
    %cst_17 = arith.constant 5.000000e-01 : f32
    %25 = vector.broadcast %cst_17 : f32 to vector<8x32xf32>
    %26 = arith.addf %24, %25 : vector<8x32xf32>
    %27 = vector.extract_strided_slice %10 {offsets = [0, 64], sizes = [8, 32], strides = [1, 1]} : vector<8x128xf32> to vector<8x32xf32>
    %28 = math.tanh %27 : vector<8x32xf32>
    %29 = vector.extract_strided_slice %10 {offsets = [0, 96], sizes = [8, 32], strides = [1, 1]} : vector<8x128xf32> to vector<8x32xf32>
    %cst_18 = arith.constant 5.000000e-01 : f32
    %30 = vector.broadcast %cst_18 : f32 to vector<8x32xf32>
    %31 = arith.mulf %30, %29 : vector<8x32xf32>
    %32 = math.tanh %31 : vector<8x32xf32>
    %cst_19 = arith.constant 5.000000e-01 : f32
    %33 = vector.broadcast %cst_19 : f32 to vector<8x32xf32>
    %34 = arith.mulf %33, %32 : vector<8x32xf32>
    %cst_20 = arith.constant 5.000000e-01 : f32
    %35 = vector.broadcast %cst_20 : f32 to vector<8x32xf32>
    %36 = arith.addf %34, %35 : vector<8x32xf32>
    %37 = arith.mulf %26, %6 : vector<8x32xf32>
    %38 = arith.mulf %18, %28 : vector<8x32xf32>
    %39 = arith.addf %37, %38 : vector<8x32xf32>
    %40 = math.tanh %39 : vector<8x32xf32>
    %41 = arith.mulf %36, %40 : vector<8x32xf32>
    %cst_21 = arith.constant dense<0.000000e+00> : vector<8x128xf32>
    %42 = tpu.matmul %41, %4, %cst_21 {dimension_numbers = #tpu.dot_dimension_numbers<[1], [0], [0], [1], [0, 0, 1, 1], [], []>} : vector<8x32xf32>, vector<32x128xf32>, vector<8x128xf32> -> vector<8x128xf32>
    %43 = vector.broadcast %5 : vector<1x128xf32> to vector<8x128xf32>
    %44 = arith.addf %42, %43 : vector<8x128xf32>
    %45 = vector.extract_strided_slice %44 {offsets = [0, 0], sizes = [8, 32], strides = [1, 1]} : vector<8x128xf32> to vector<8x32xf32>
    %cst_22 = arith.constant 5.000000e-01 : f32
    %46 = vector.broadcast %cst_22 : f32 to vector<8x32xf32>
    %47 = arith.mulf %46, %45 : vector<8x32xf32>
    %48 = math.tanh %47 : vector<8x32xf32>
    %cst_23 = arith.constant 5.000000e-01 : f32
    %49 = vector.broadcast %cst_23 : f32 to vector<8x32xf32>
    %50 = arith.mulf %49, %48 : vector<8x32xf32>
    %cst_24 = arith.constant 5.000000e-01 : f32
    %51 = vector.broadcast %cst_24 : f32 to vector<8x32xf32>
    %52 = arith.addf %50, %51 : vector<8x32xf32>
    %53 = vector.extract_strided_slice %44 {offsets = [0, 32], sizes = [8, 32], strides = [1, 1]} : vector<8x128xf32> to vector<8x32xf32>
    %cst_25 = arith.constant 5.000000e-01 : f32
    %54 = vector.broadcast %cst_25 : f32 to vector<8x32xf32>
    %55 = arith.mulf %54, %53 : vector<8x32xf32>
    %56 = math.tanh %55 : vector<8x32xf32>
    %cst_26 = arith.constant 5.000000e-01 : f32
    %57 = vector.broadcast %cst_26 : f32 to vector<8x32xf32>
    %58 = arith.mulf %57, %56 : vector<8x32xf32>
    %cst_27 = arith.constant 5.000000e-01 : f32
    %59 = vector.broadcast %cst_27 : f32 to vector<8x32xf32>
    %60 = arith.addf %58, %59 : vector<8x32xf32>
    %61 = vector.extract_strided_slice %44 {offsets = [0, 64], sizes = [8, 32], strides = [1, 1]} : vector<8x128xf32> to vector<8x32xf32>
    %62 = math.tanh %61 : vector<8x32xf32>
    %63 = vector.extract_strided_slice %44 {offsets = [0, 96], sizes = [8, 32], strides = [1, 1]} : vector<8x128xf32> to vector<8x32xf32>
    %cst_28 = arith.constant 5.000000e-01 : f32
    %64 = vector.broadcast %cst_28 : f32 to vector<8x32xf32>
    %65 = arith.mulf %64, %63 : vector<8x32xf32>
    %66 = math.tanh %65 : vector<8x32xf32>
    %cst_29 = arith.constant 5.000000e-01 : f32
    %67 = vector.broadcast %cst_29 : f32 to vector<8x32xf32>
    %68 = arith.mulf %67, %66 : vector<8x32xf32>
    %cst_30 = arith.constant 5.000000e-01 : f32
    %69 = vector.broadcast %cst_30 : f32 to vector<8x32xf32>
    %70 = arith.addf %68, %69 : vector<8x32xf32>
    %71 = arith.mulf %60, %7 : vector<8x32xf32>
    %72 = arith.mulf %52, %62 : vector<8x32xf32>
    %73 = arith.addf %71, %72 : vector<8x32xf32>
    %74 = math.tanh %73 : vector<8x32xf32>
    %75 = arith.mulf %70, %74 : vector<8x32xf32>
    %c0_i32 = arith.constant 0 : i32
    %76 = arith.cmpi eq, %1, %c0_i32 : i32
    %77 = arith.select %76, %75, %8 : vector<8x32xf32>
    %c1_31 = arith.constant 1 : index
    %c0_32 = arith.constant 0 : index
    %c0_33 = arith.constant 0 : index
    %78 = vector.load %arg2[%c1_31, %c0_32, %c0_33] : memref<8x8x128xf32, #tpu.memory_space<vmem>>, vector<1x8x128xf32>
    %79 = vector.shape_cast %78 : vector<1x8x128xf32> to vector<8x128xf32>
    %cst_34 = arith.constant dense<0.000000e+00> : vector<8x128xf32>
    %80 = tpu.matmul %41, %2, %cst_34 {dimension_numbers = #tpu.dot_dimension_numbers<[1], [0], [0], [1], [0, 0, 1, 1], [], []>} : vector<8x32xf32>, vector<32x128xf32>, vector<8x128xf32> -> vector<8x128xf32>
    %81 = arith.addf %79, %80 : vector<8x128xf32>
    %82 = vector.extract_strided_slice %81 {offsets = [0, 0], sizes = [8, 32], strides = [1, 1]} : vector<8x128xf32> to vector<8x32xf32>
    %cst_35 = arith.constant 5.000000e-01 : f32
    %83 = vector.broadcast %cst_35 : f32 to vector<8x32xf32>
    %84 = arith.mulf %83, %82 : vector<8x32xf32>
    %85 = math.tanh %84 : vector<8x32xf32>
    %cst_36 = arith.constant 5.000000e-01 : f32
    %86 = vector.broadcast %cst_36 : f32 to vector<8x32xf32>
    %87 = arith.mulf %86, %85 : vector<8x32xf32>
    %cst_37 = arith.constant 5.000000e-01 : f32
    %88 = vector.broadcast %cst_37 : f32 to vector<8x32xf32>
    %89 = arith.addf %87, %88 : vector<8x32xf32>
    %90 = vector.extract_strided_slice %81 {offsets = [0, 32], sizes = [8, 32], strides = [1, 1]} : vector<8x128xf32> to vector<8x32xf32>
    %cst_38 = arith.constant 5.000000e-01 : f32
    %91 = vector.broadcast %cst_38 : f32 to vector<8x32xf32>
    %92 = arith.mulf %91, %90 : vector<8x32xf32>
    %93 = math.tanh %92 : vector<8x32xf32>
    %cst_39 = arith.constant 5.000000e-01 : f32
    %94 = vector.broadcast %cst_39 : f32 to vector<8x32xf32>
    %95 = arith.mulf %94, %93 : vector<8x32xf32>
    %cst_40 = arith.constant 5.000000e-01 : f32
    %96 = vector.broadcast %cst_40 : f32 to vector<8x32xf32>
    %97 = arith.addf %95, %96 : vector<8x32xf32>
    %98 = vector.extract_strided_slice %81 {offsets = [0, 64], sizes = [8, 32], strides = [1, 1]} : vector<8x128xf32> to vector<8x32xf32>
    %99 = math.tanh %98 : vector<8x32xf32>
    %100 = vector.extract_strided_slice %81 {offsets = [0, 96], sizes = [8, 32], strides = [1, 1]} : vector<8x128xf32> to vector<8x32xf32>
    %cst_41 = arith.constant 5.000000e-01 : f32
    %101 = vector.broadcast %cst_41 : f32 to vector<8x32xf32>
    %102 = arith.mulf %101, %100 : vector<8x32xf32>
    %103 = math.tanh %102 : vector<8x32xf32>
    %cst_42 = arith.constant 5.000000e-01 : f32
    %104 = vector.broadcast %cst_42 : f32 to vector<8x32xf32>
    %105 = arith.mulf %104, %103 : vector<8x32xf32>
    %cst_43 = arith.constant 5.000000e-01 : f32
    %106 = vector.broadcast %cst_43 : f32 to vector<8x32xf32>
    %107 = arith.addf %105, %106 : vector<8x32xf32>
    %108 = arith.mulf %97, %39 : vector<8x32xf32>
    %109 = arith.mulf %89, %99 : vector<8x32xf32>
    %110 = arith.addf %108, %109 : vector<8x32xf32>
    %111 = math.tanh %110 : vector<8x32xf32>
    %112 = arith.mulf %107, %111 : vector<8x32xf32>
    %cst_44 = arith.constant dense<0.000000e+00> : vector<8x128xf32>
    %113 = tpu.matmul %112, %4, %cst_44 {dimension_numbers = #tpu.dot_dimension_numbers<[1], [0], [0], [1], [0, 0, 1, 1], [], []>} : vector<8x32xf32>, vector<32x128xf32>, vector<8x128xf32> -> vector<8x128xf32>
    %114 = vector.broadcast %5 : vector<1x128xf32> to vector<8x128xf32>
    %115 = arith.addf %113, %114 : vector<8x128xf32>
    %cst_45 = arith.constant dense<0.000000e+00> : vector<8x128xf32>
    %116 = tpu.matmul %75, %3, %cst_45 {dimension_numbers = #tpu.dot_dimension_numbers<[1], [0], [0], [1], [0, 0, 1, 1], [], []>} : vector<8x32xf32>, vector<32x128xf32>, vector<8x128xf32> -> vector<8x128xf32>
    %117 = arith.addf %115, %116 : vector<8x128xf32>
    %118 = vector.extract_strided_slice %117 {offsets = [0, 0], sizes = [8, 32], strides = [1, 1]} : vector<8x128xf32> to vector<8x32xf32>
    %cst_46 = arith.constant 5.000000e-01 : f32
    %119 = vector.broadcast %cst_46 : f32 to vector<8x32xf32>
    %120 = arith.mulf %119, %118 : vector<8x32xf32>
    %121 = math.tanh %120 : vector<8x32xf32>
    %cst_47 = arith.constant 5.000000e-01 : f32
    %122 = vector.broadcast %cst_47 : f32 to vector<8x32xf32>
    %123 = arith.mulf %122, %121 : vector<8x32xf32>
    %cst_48 = arith.constant 5.000000e-01 : f32
    %124 = vector.broadcast %cst_48 : f32 to vector<8x32xf32>
    %125 = arith.addf %123, %124 : vector<8x32xf32>
    %126 = vector.extract_strided_slice %117 {offsets = [0, 32], sizes = [8, 32], strides = [1, 1]} : vector<8x128xf32> to vector<8x32xf32>
    %cst_49 = arith.constant 5.000000e-01 : f32
    %127 = vector.broadcast %cst_49 : f32 to vector<8x32xf32>
    %128 = arith.mulf %127, %126 : vector<8x32xf32>
    %129 = math.tanh %128 : vector<8x32xf32>
    %cst_50 = arith.constant 5.000000e-01 : f32
    %130 = vector.broadcast %cst_50 : f32 to vector<8x32xf32>
    %131 = arith.mulf %130, %129 : vector<8x32xf32>
    %cst_51 = arith.constant 5.000000e-01 : f32
    %132 = vector.broadcast %cst_51 : f32 to vector<8x32xf32>
    %133 = arith.addf %131, %132 : vector<8x32xf32>
    %134 = vector.extract_strided_slice %117 {offsets = [0, 64], sizes = [8, 32], strides = [1, 1]} : vector<8x128xf32> to vector<8x32xf32>
    %135 = math.tanh %134 : vector<8x32xf32>
    %136 = vector.extract_strided_slice %117 {offsets = [0, 96], sizes = [8, 32], strides = [1, 1]} : vector<8x128xf32> to vector<8x32xf32>
    %cst_52 = arith.constant 5.000000e-01 : f32
    %137 = vector.broadcast %cst_52 : f32 to vector<8x32xf32>
    %138 = arith.mulf %137, %136 : vector<8x32xf32>
    %139 = math.tanh %138 : vector<8x32xf32>
    %cst_53 = arith.constant 5.000000e-01 : f32
    %140 = vector.broadcast %cst_53 : f32 to vector<8x32xf32>
    %141 = arith.mulf %140, %139 : vector<8x32xf32>
    %cst_54 = arith.constant 5.000000e-01 : f32
    %142 = vector.broadcast %cst_54 : f32 to vector<8x32xf32>
    %143 = arith.addf %141, %142 : vector<8x32xf32>
    %144 = arith.mulf %133, %73 : vector<8x32xf32>
    %145 = arith.mulf %125, %135 : vector<8x32xf32>
    %146 = arith.addf %144, %145 : vector<8x32xf32>
    %147 = math.tanh %146 : vector<8x32xf32>
    %148 = arith.mulf %143, %147 : vector<8x32xf32>
    %c1_i32_55 = arith.constant 1 : i32
    %149 = arith.cmpi eq, %1, %c1_i32_55 : i32
    %150 = arith.select %149, %148, %77 : vector<8x32xf32>
    %c2 = arith.constant 2 : index
    %c0_56 = arith.constant 0 : index
    %c0_57 = arith.constant 0 : index
    %151 = vector.load %arg2[%c2, %c0_56, %c0_57] : memref<8x8x128xf32, #tpu.memory_space<vmem>>, vector<1x8x128xf32>
    %152 = vector.shape_cast %151 : vector<1x8x128xf32> to vector<8x128xf32>
    %cst_58 = arith.constant dense<0.000000e+00> : vector<8x128xf32>
    %153 = tpu.matmul %112, %2, %cst_58 {dimension_numbers = #tpu.dot_dimension_numbers<[1], [0], [0], [1], [0, 0, 1, 1], [], []>} : vector<8x32xf32>, vector<32x128xf32>, vector<8x128xf32> -> vector<8x128xf32>
    %154 = arith.addf %152, %153 : vector<8x128xf32>
    %155 = vector.extract_strided_slice %154 {offsets = [0, 0], sizes = [8, 32], strides = [1, 1]} : vector<8x128xf32> to vector<8x32xf32>
    %cst_59 = arith.constant 5.000000e-01 : f32
    %156 = vector.broadcast %cst_59 : f32 to vector<8x32xf32>
    %157 = arith.mulf %156, %155 : vector<8x32xf32>
    %158 = math.tanh %157 : vector<8x32xf32>
    %cst_60 = arith.constant 5.000000e-01 : f32
    %159 = vector.broadcast %cst_60 : f32 to vector<8x32xf32>
    %160 = arith.mulf %159, %158 : vector<8x32xf32>
    %cst_61 = arith.constant 5.000000e-01 : f32
    %161 = vector.broadcast %cst_61 : f32 to vector<8x32xf32>
    %162 = arith.addf %160, %161 : vector<8x32xf32>
    %163 = vector.extract_strided_slice %154 {offsets = [0, 32], sizes = [8, 32], strides = [1, 1]} : vector<8x128xf32> to vector<8x32xf32>
    %cst_62 = arith.constant 5.000000e-01 : f32
    %164 = vector.broadcast %cst_62 : f32 to vector<8x32xf32>
    %165 = arith.mulf %164, %163 : vector<8x32xf32>
    %166 = math.tanh %165 : vector<8x32xf32>
    %cst_63 = arith.constant 5.000000e-01 : f32
    %167 = vector.broadcast %cst_63 : f32 to vector<8x32xf32>
    %168 = arith.mulf %167, %166 : vector<8x32xf32>
    %cst_64 = arith.constant 5.000000e-01 : f32
    %169 = vector.broadcast %cst_64 : f32 to vector<8x32xf32>
    %170 = arith.addf %168, %169 : vector<8x32xf32>
    %171 = vector.extract_strided_slice %154 {offsets = [0, 64], sizes = [8, 32], strides = [1, 1]} : vector<8x128xf32> to vector<8x32xf32>
    %172 = math.tanh %171 : vector<8x32xf32>
    %173 = vector.extract_strided_slice %154 {offsets = [0, 96], sizes = [8, 32], strides = [1, 1]} : vector<8x128xf32> to vector<8x32xf32>
    %cst_65 = arith.constant 5.000000e-01 : f32
    %174 = vector.broadcast %cst_65 : f32 to vector<8x32xf32>
    %175 = arith.mulf %174, %173 : vector<8x32xf32>
    %176 = math.tanh %175 : vector<8x32xf32>
    %cst_66 = arith.constant 5.000000e-01 : f32
    %177 = vector.broadcast %cst_66 : f32 to vector<8x32xf32>
    %178 = arith.mulf %177, %176 : vector<8x32xf32>
    %cst_67 = arith.constant 5.000000e-01 : f32
    %179 = vector.broadcast %cst_67 : f32 to vector<8x32xf32>
    %180 = arith.addf %178, %179 : vector<8x32xf32>
    %181 = arith.mulf %170, %110 : vector<8x32xf32>
    %182 = arith.mulf %162, %172 : vector<8x32xf32>
    %183 = arith.addf %181, %182 : vector<8x32xf32>
    %184 = math.tanh %183 : vector<8x32xf32>
    %185 = arith.mulf %180, %184 : vector<8x32xf32>
    %cst_68 = arith.constant dense<0.000000e+00> : vector<8x128xf32>
    %186 = tpu.matmul %185, %4, %cst_68 {dimension_numbers = #tpu.dot_dimension_numbers<[1], [0], [0], [1], [0, 0, 1, 1], [], []>} : vector<8x32xf32>, vector<32x128xf32>, vector<8x128xf32> -> vector<8x128xf32>
    %187 = vector.broadcast %5 : vector<1x128xf32> to vector<8x128xf32>
    %188 = arith.addf %186, %187 : vector<8x128xf32>
    %cst_69 = arith.constant dense<0.000000e+00> : vector<8x128xf32>
    %189 = tpu.matmul %148, %3, %cst_69 {dimension_numbers = #tpu.dot_dimension_numbers<[1], [0], [0], [1], [0, 0, 1, 1], [], []>} : vector<8x32xf32>, vector<32x128xf32>, vector<8x128xf32> -> vector<8x128xf32>
    %190 = arith.addf %188, %189 : vector<8x128xf32>
    %191 = vector.extract_strided_slice %190 {offsets = [0, 0], sizes = [8, 32], strides = [1, 1]} : vector<8x128xf32> to vector<8x32xf32>
    %cst_70 = arith.constant 5.000000e-01 : f32
    %192 = vector.broadcast %cst_70 : f32 to vector<8x32xf32>
    %193 = arith.mulf %192, %191 : vector<8x32xf32>
    %194 = math.tanh %193 : vector<8x32xf32>
    %cst_71 = arith.constant 5.000000e-01 : f32
    %195 = vector.broadcast %cst_71 : f32 to vector<8x32xf32>
    %196 = arith.mulf %195, %194 : vector<8x32xf32>
    %cst_72 = arith.constant 5.000000e-01 : f32
    %197 = vector.broadcast %cst_72 : f32 to vector<8x32xf32>
    %198 = arith.addf %196, %197 : vector<8x32xf32>
    %199 = vector.extract_strided_slice %190 {offsets = [0, 32], sizes = [8, 32], strides = [1, 1]} : vector<8x128xf32> to vector<8x32xf32>
    %cst_73 = arith.constant 5.000000e-01 : f32
    %200 = vector.broadcast %cst_73 : f32 to vector<8x32xf32>
    %201 = arith.mulf %200, %199 : vector<8x32xf32>
    %202 = math.tanh %201 : vector<8x32xf32>
    %cst_74 = arith.constant 5.000000e-01 : f32
    %203 = vector.broadcast %cst_74 : f32 to vector<8x32xf32>
    %204 = arith.mulf %203, %202 : vector<8x32xf32>
    %cst_75 = arith.constant 5.000000e-01 : f32
    %205 = vector.broadcast %cst_75 : f32 to vector<8x32xf32>
    %206 = arith.addf %204, %205 : vector<8x32xf32>
    %207 = vector.extract_strided_slice %190 {offsets = [0, 64], sizes = [8, 32], strides = [1, 1]} : vector<8x128xf32> to vector<8x32xf32>
    %208 = math.tanh %207 : vector<8x32xf32>
    %209 = vector.extract_strided_slice %190 {offsets = [0, 96], sizes = [8, 32], strides = [1, 1]} : vector<8x128xf32> to vector<8x32xf32>
    %cst_76 = arith.constant 5.000000e-01 : f32
    %210 = vector.broadcast %cst_76 : f32 to vector<8x32xf32>
    %211 = arith.mulf %210, %209 : vector<8x32xf32>
    %212 = math.tanh %211 : vector<8x32xf32>
    %cst_77 = arith.constant 5.000000e-01 : f32
    %213 = vector.broadcast %cst_77 : f32 to vector<8x32xf32>
    %214 = arith.mulf %213, %212 : vector<8x32xf32>
    %cst_78 = arith.constant 5.000000e-01 : f32
    %215 = vector.broadcast %cst_78 : f32 to vector<8x32xf32>
    %216 = arith.addf %214, %215 : vector<8x32xf32>
    %217 = arith.mulf %206, %146 : vector<8x32xf32>
    %218 = arith.mulf %198, %208 : vector<8x32xf32>
    %219 = arith.addf %217, %218 : vector<8x32xf32>
    %220 = math.tanh %219 : vector<8x32xf32>
    %221 = arith.mulf %216, %220 : vector<8x32xf32>
    %c2_i32 = arith.constant 2 : i32
    %222 = arith.cmpi eq, %1, %c2_i32 : i32
    %223 = arith.select %222, %221, %150 : vector<8x32xf32>
    %c3 = arith.constant 3 : index
    %c0_79 = arith.constant 0 : index
    %c0_80 = arith.constant 0 : index
    %224 = vector.load %arg2[%c3, %c0_79, %c0_80] : memref<8x8x128xf32, #tpu.memory_space<vmem>>, vector<1x8x128xf32>
    %225 = vector.shape_cast %224 : vector<1x8x128xf32> to vector<8x128xf32>
    %cst_81 = arith.constant dense<0.000000e+00> : vector<8x128xf32>
    %226 = tpu.matmul %185, %2, %cst_81 {dimension_numbers = #tpu.dot_dimension_numbers<[1], [0], [0], [1], [0, 0, 1, 1], [], []>} : vector<8x32xf32>, vector<32x128xf32>, vector<8x128xf32> -> vector<8x128xf32>
    %227 = arith.addf %225, %226 : vector<8x128xf32>
    %228 = vector.extract_strided_slice %227 {offsets = [0, 0], sizes = [8, 32], strides = [1, 1]} : vector<8x128xf32> to vector<8x32xf32>
    %cst_82 = arith.constant 5.000000e-01 : f32
    %229 = vector.broadcast %cst_82 : f32 to vector<8x32xf32>
    %230 = arith.mulf %229, %228 : vector<8x32xf32>
    %231 = math.tanh %230 : vector<8x32xf32>
    %cst_83 = arith.constant 5.000000e-01 : f32
    %232 = vector.broadcast %cst_83 : f32 to vector<8x32xf32>
    %233 = arith.mulf %232, %231 : vector<8x32xf32>
    %cst_84 = arith.constant 5.000000e-01 : f32
    %234 = vector.broadcast %cst_84 : f32 to vector<8x32xf32>
    %235 = arith.addf %233, %234 : vector<8x32xf32>
    %236 = vector.extract_strided_slice %227 {offsets = [0, 32], sizes = [8, 32], strides = [1, 1]} : vector<8x128xf32> to vector<8x32xf32>
    %cst_85 = arith.constant 5.000000e-01 : f32
    %237 = vector.broadcast %cst_85 : f32 to vector<8x32xf32>
    %238 = arith.mulf %237, %236 : vector<8x32xf32>
    %239 = math.tanh %238 : vector<8x32xf32>
    %cst_86 = arith.constant 5.000000e-01 : f32
    %240 = vector.broadcast %cst_86 : f32 to vector<8x32xf32>
    %241 = arith.mulf %240, %239 : vector<8x32xf32>
    %cst_87 = arith.constant 5.000000e-01 : f32
    %242 = vector.broadcast %cst_87 : f32 to vector<8x32xf32>
    %243 = arith.addf %241, %242 : vector<8x32xf32>
    %244 = vector.extract_strided_slice %227 {offsets = [0, 64], sizes = [8, 32], strides = [1, 1]} : vector<8x128xf32> to vector<8x32xf32>
    %245 = math.tanh %244 : vector<8x32xf32>
    %246 = vector.extract_strided_slice %227 {offsets = [0, 96], sizes = [8, 32], strides = [1, 1]} : vector<8x128xf32> to vector<8x32xf32>
    %cst_88 = arith.constant 5.000000e-01 : f32
    %247 = vector.broadcast %cst_88 : f32 to vector<8x32xf32>
    %248 = arith.mulf %247, %246 : vector<8x32xf32>
    %249 = math.tanh %248 : vector<8x32xf32>
    %cst_89 = arith.constant 5.000000e-01 : f32
    %250 = vector.broadcast %cst_89 : f32 to vector<8x32xf32>
    %251 = arith.mulf %250, %249 : vector<8x32xf32>
    %cst_90 = arith.constant 5.000000e-01 : f32
    %252 = vector.broadcast %cst_90 : f32 to vector<8x32xf32>
    %253 = arith.addf %251, %252 : vector<8x32xf32>
    %254 = arith.mulf %243, %183 : vector<8x32xf32>
    %255 = arith.mulf %235, %245 : vector<8x32xf32>
    %256 = arith.addf %254, %255 : vector<8x32xf32>
    %257 = math.tanh %256 : vector<8x32xf32>
    %258 = arith.mulf %253, %257 : vector<8x32xf32>
    %cst_91 = arith.constant dense<0.000000e+00> : vector<8x128xf32>
    %259 = tpu.matmul %258, %4, %cst_91 {dimension_numbers = #tpu.dot_dimension_numbers<[1], [0], [0], [1], [0, 0, 1, 1], [], []>} : vector<8x32xf32>, vector<32x128xf32>, vector<8x128xf32> -> vector<8x128xf32>
    %260 = vector.broadcast %5 : vector<1x128xf32> to vector<8x128xf32>
    %261 = arith.addf %259, %260 : vector<8x128xf32>
    %cst_92 = arith.constant dense<0.000000e+00> : vector<8x128xf32>
    %262 = tpu.matmul %221, %3, %cst_92 {dimension_numbers = #tpu.dot_dimension_numbers<[1], [0], [0], [1], [0, 0, 1, 1], [], []>} : vector<8x32xf32>, vector<32x128xf32>, vector<8x128xf32> -> vector<8x128xf32>
    %263 = arith.addf %261, %262 : vector<8x128xf32>
    %264 = vector.extract_strided_slice %263 {offsets = [0, 0], sizes = [8, 32], strides = [1, 1]} : vector<8x128xf32> to vector<8x32xf32>
    %cst_93 = arith.constant 5.000000e-01 : f32
    %265 = vector.broadcast %cst_93 : f32 to vector<8x32xf32>
    %266 = arith.mulf %265, %264 : vector<8x32xf32>
    %267 = math.tanh %266 : vector<8x32xf32>
    %cst_94 = arith.constant 5.000000e-01 : f32
    %268 = vector.broadcast %cst_94 : f32 to vector<8x32xf32>
    %269 = arith.mulf %268, %267 : vector<8x32xf32>
    %cst_95 = arith.constant 5.000000e-01 : f32
    %270 = vector.broadcast %cst_95 : f32 to vector<8x32xf32>
    %271 = arith.addf %269, %270 : vector<8x32xf32>
    %272 = vector.extract_strided_slice %263 {offsets = [0, 32], sizes = [8, 32], strides = [1, 1]} : vector<8x128xf32> to vector<8x32xf32>
    %cst_96 = arith.constant 5.000000e-01 : f32
    %273 = vector.broadcast %cst_96 : f32 to vector<8x32xf32>
    %274 = arith.mulf %273, %272 : vector<8x32xf32>
    %275 = math.tanh %274 : vector<8x32xf32>
    %cst_97 = arith.constant 5.000000e-01 : f32
    %276 = vector.broadcast %cst_97 : f32 to vector<8x32xf32>
    %277 = arith.mulf %276, %275 : vector<8x32xf32>
    %cst_98 = arith.constant 5.000000e-01 : f32
    %278 = vector.broadcast %cst_98 : f32 to vector<8x32xf32>
    %279 = arith.addf %277, %278 : vector<8x32xf32>
    %280 = vector.extract_strided_slice %263 {offsets = [0, 64], sizes = [8, 32], strides = [1, 1]} : vector<8x128xf32> to vector<8x32xf32>
    %281 = math.tanh %280 : vector<8x32xf32>
    %282 = vector.extract_strided_slice %263 {offsets = [0, 96], sizes = [8, 32], strides = [1, 1]} : vector<8x128xf32> to vector<8x32xf32>
    %cst_99 = arith.constant 5.000000e-01 : f32
    %283 = vector.broadcast %cst_99 : f32 to vector<8x32xf32>
    %284 = arith.mulf %283, %282 : vector<8x32xf32>
    %285 = math.tanh %284 : vector<8x32xf32>
    %cst_100 = arith.constant 5.000000e-01 : f32
    %286 = vector.broadcast %cst_100 : f32 to vector<8x32xf32>
    %287 = arith.mulf %286, %285 : vector<8x32xf32>
    %cst_101 = arith.constant 5.000000e-01 : f32
    %288 = vector.broadcast %cst_101 : f32 to vector<8x32xf32>
    %289 = arith.addf %287, %288 : vector<8x32xf32>
    %290 = arith.mulf %279, %219 : vector<8x32xf32>
    %291 = arith.mulf %271, %281 : vector<8x32xf32>
    %292 = arith.addf %290, %291 : vector<8x32xf32>
    %293 = math.tanh %292 : vector<8x32xf32>
    %294 = arith.mulf %289, %293 : vector<8x32xf32>
    %c3_i32 = arith.constant 3 : i32
    %295 = arith.cmpi eq, %1, %c3_i32 : i32
    %296 = arith.select %295, %294, %223 : vector<8x32xf32>
    %c4 = arith.constant 4 : index
    %c0_102 = arith.constant 0 : index
    %c0_103 = arith.constant 0 : index
    %297 = vector.load %arg2[%c4, %c0_102, %c0_103] : memref<8x8x128xf32, #tpu.memory_space<vmem>>, vector<1x8x128xf32>
    %298 = vector.shape_cast %297 : vector<1x8x128xf32> to vector<8x128xf32>
    %cst_104 = arith.constant dense<0.000000e+00> : vector<8x128xf32>
    %299 = tpu.matmul %258, %2, %cst_104 {dimension_numbers = #tpu.dot_dimension_numbers<[1], [0], [0], [1], [0, 0, 1, 1], [], []>} : vector<8x32xf32>, vector<32x128xf32>, vector<8x128xf32> -> vector<8x128xf32>
    %300 = arith.addf %298, %299 : vector<8x128xf32>
    %301 = vector.extract_strided_slice %300 {offsets = [0, 0], sizes = [8, 32], strides = [1, 1]} : vector<8x128xf32> to vector<8x32xf32>
    %cst_105 = arith.constant 5.000000e-01 : f32
    %302 = vector.broadcast %cst_105 : f32 to vector<8x32xf32>
    %303 = arith.mulf %302, %301 : vector<8x32xf32>
    %304 = math.tanh %303 : vector<8x32xf32>
    %cst_106 = arith.constant 5.000000e-01 : f32
    %305 = vector.broadcast %cst_106 : f32 to vector<8x32xf32>
    %306 = arith.mulf %305, %304 : vector<8x32xf32>
    %cst_107 = arith.constant 5.000000e-01 : f32
    %307 = vector.broadcast %cst_107 : f32 to vector<8x32xf32>
    %308 = arith.addf %306, %307 : vector<8x32xf32>
    %309 = vector.extract_strided_slice %300 {offsets = [0, 32], sizes = [8, 32], strides = [1, 1]} : vector<8x128xf32> to vector<8x32xf32>
    %cst_108 = arith.constant 5.000000e-01 : f32
    %310 = vector.broadcast %cst_108 : f32 to vector<8x32xf32>
    %311 = arith.mulf %310, %309 : vector<8x32xf32>
    %312 = math.tanh %311 : vector<8x32xf32>
    %cst_109 = arith.constant 5.000000e-01 : f32
    %313 = vector.broadcast %cst_109 : f32 to vector<8x32xf32>
    %314 = arith.mulf %313, %312 : vector<8x32xf32>
    %cst_110 = arith.constant 5.000000e-01 : f32
    %315 = vector.broadcast %cst_110 : f32 to vector<8x32xf32>
    %316 = arith.addf %314, %315 : vector<8x32xf32>
    %317 = vector.extract_strided_slice %300 {offsets = [0, 64], sizes = [8, 32], strides = [1, 1]} : vector<8x128xf32> to vector<8x32xf32>
    %318 = math.tanh %317 : vector<8x32xf32>
    %319 = vector.extract_strided_slice %300 {offsets = [0, 96], sizes = [8, 32], strides = [1, 1]} : vector<8x128xf32> to vector<8x32xf32>
    %cst_111 = arith.constant 5.000000e-01 : f32
    %320 = vector.broadcast %cst_111 : f32 to vector<8x32xf32>
    %321 = arith.mulf %320, %319 : vector<8x32xf32>
    %322 = math.tanh %321 : vector<8x32xf32>
    %cst_112 = arith.constant 5.000000e-01 : f32
    %323 = vector.broadcast %cst_112 : f32 to vector<8x32xf32>
    %324 = arith.mulf %323, %322 : vector<8x32xf32>
    %cst_113 = arith.constant 5.000000e-01 : f32
    %325 = vector.broadcast %cst_113 : f32 to vector<8x32xf32>
    %326 = arith.addf %324, %325 : vector<8x32xf32>
    %327 = arith.mulf %316, %256 : vector<8x32xf32>
    %328 = arith.mulf %308, %318 : vector<8x32xf32>
    %329 = arith.addf %327, %328 : vector<8x32xf32>
    %330 = math.tanh %329 : vector<8x32xf32>
    %331 = arith.mulf %326, %330 : vector<8x32xf32>
    %cst_114 = arith.constant dense<0.000000e+00> : vector<8x128xf32>
    %332 = tpu.matmul %331, %4, %cst_114 {dimension_numbers = #tpu.dot_dimension_numbers<[1], [0], [0], [1], [0, 0, 1, 1], [], []>} : vector<8x32xf32>, vector<32x128xf32>, vector<8x128xf32> -> vector<8x128xf32>
    %333 = vector.broadcast %5 : vector<1x128xf32> to vector<8x128xf32>
    %334 = arith.addf %332, %333 : vector<8x128xf32>
    %cst_115 = arith.constant dense<0.000000e+00> : vector<8x128xf32>
    %335 = tpu.matmul %294, %3, %cst_115 {dimension_numbers = #tpu.dot_dimension_numbers<[1], [0], [0], [1], [0, 0, 1, 1], [], []>} : vector<8x32xf32>, vector<32x128xf32>, vector<8x128xf32> -> vector<8x128xf32>
    %336 = arith.addf %334, %335 : vector<8x128xf32>
    %337 = vector.extract_strided_slice %336 {offsets = [0, 0], sizes = [8, 32], strides = [1, 1]} : vector<8x128xf32> to vector<8x32xf32>
    %cst_116 = arith.constant 5.000000e-01 : f32
    %338 = vector.broadcast %cst_116 : f32 to vector<8x32xf32>
    %339 = arith.mulf %338, %337 : vector<8x32xf32>
    %340 = math.tanh %339 : vector<8x32xf32>
    %cst_117 = arith.constant 5.000000e-01 : f32
    %341 = vector.broadcast %cst_117 : f32 to vector<8x32xf32>
    %342 = arith.mulf %341, %340 : vector<8x32xf32>
    %cst_118 = arith.constant 5.000000e-01 : f32
    %343 = vector.broadcast %cst_118 : f32 to vector<8x32xf32>
    %344 = arith.addf %342, %343 : vector<8x32xf32>
    %345 = vector.extract_strided_slice %336 {offsets = [0, 32], sizes = [8, 32], strides = [1, 1]} : vector<8x128xf32> to vector<8x32xf32>
    %cst_119 = arith.constant 5.000000e-01 : f32
    %346 = vector.broadcast %cst_119 : f32 to vector<8x32xf32>
    %347 = arith.mulf %346, %345 : vector<8x32xf32>
    %348 = math.tanh %347 : vector<8x32xf32>
    %cst_120 = arith.constant 5.000000e-01 : f32
    %349 = vector.broadcast %cst_120 : f32 to vector<8x32xf32>
    %350 = arith.mulf %349, %348 : vector<8x32xf32>
    %cst_121 = arith.constant 5.000000e-01 : f32
    %351 = vector.broadcast %cst_121 : f32 to vector<8x32xf32>
    %352 = arith.addf %350, %351 : vector<8x32xf32>
    %353 = vector.extract_strided_slice %336 {offsets = [0, 64], sizes = [8, 32], strides = [1, 1]} : vector<8x128xf32> to vector<8x32xf32>
    %354 = math.tanh %353 : vector<8x32xf32>
    %355 = vector.extract_strided_slice %336 {offsets = [0, 96], sizes = [8, 32], strides = [1, 1]} : vector<8x128xf32> to vector<8x32xf32>
    %cst_122 = arith.constant 5.000000e-01 : f32
    %356 = vector.broadcast %cst_122 : f32 to vector<8x32xf32>
    %357 = arith.mulf %356, %355 : vector<8x32xf32>
    %358 = math.tanh %357 : vector<8x32xf32>
    %cst_123 = arith.constant 5.000000e-01 : f32
    %359 = vector.broadcast %cst_123 : f32 to vector<8x32xf32>
    %360 = arith.mulf %359, %358 : vector<8x32xf32>
    %cst_124 = arith.constant 5.000000e-01 : f32
    %361 = vector.broadcast %cst_124 : f32 to vector<8x32xf32>
    %362 = arith.addf %360, %361 : vector<8x32xf32>
    %363 = arith.mulf %352, %292 : vector<8x32xf32>
    %364 = arith.mulf %344, %354 : vector<8x32xf32>
    %365 = arith.addf %363, %364 : vector<8x32xf32>
    %366 = math.tanh %365 : vector<8x32xf32>
    %367 = arith.mulf %362, %366 : vector<8x32xf32>
    %c4_i32 = arith.constant 4 : i32
    %368 = arith.cmpi eq, %1, %c4_i32 : i32
    %369 = arith.select %368, %367, %296 : vector<8x32xf32>
    %c5 = arith.constant 5 : index
    %c0_125 = arith.constant 0 : index
    %c0_126 = arith.constant 0 : index
    %370 = vector.load %arg2[%c5, %c0_125, %c0_126] : memref<8x8x128xf32, #tpu.memory_space<vmem>>, vector<1x8x128xf32>
    %371 = vector.shape_cast %370 : vector<1x8x128xf32> to vector<8x128xf32>
    %cst_127 = arith.constant dense<0.000000e+00> : vector<8x128xf32>
    %372 = tpu.matmul %331, %2, %cst_127 {dimension_numbers = #tpu.dot_dimension_numbers<[1], [0], [0], [1], [0, 0, 1, 1], [], []>} : vector<8x32xf32>, vector<32x128xf32>, vector<8x128xf32> -> vector<8x128xf32>
    %373 = arith.addf %371, %372 : vector<8x128xf32>
    %374 = vector.extract_strided_slice %373 {offsets = [0, 0], sizes = [8, 32], strides = [1, 1]} : vector<8x128xf32> to vector<8x32xf32>
    %cst_128 = arith.constant 5.000000e-01 : f32
    %375 = vector.broadcast %cst_128 : f32 to vector<8x32xf32>
    %376 = arith.mulf %375, %374 : vector<8x32xf32>
    %377 = math.tanh %376 : vector<8x32xf32>
    %cst_129 = arith.constant 5.000000e-01 : f32
    %378 = vector.broadcast %cst_129 : f32 to vector<8x32xf32>
    %379 = arith.mulf %378, %377 : vector<8x32xf32>
    %cst_130 = arith.constant 5.000000e-01 : f32
    %380 = vector.broadcast %cst_130 : f32 to vector<8x32xf32>
    %381 = arith.addf %379, %380 : vector<8x32xf32>
    %382 = vector.extract_strided_slice %373 {offsets = [0, 32], sizes = [8, 32], strides = [1, 1]} : vector<8x128xf32> to vector<8x32xf32>
    %cst_131 = arith.constant 5.000000e-01 : f32
    %383 = vector.broadcast %cst_131 : f32 to vector<8x32xf32>
    %384 = arith.mulf %383, %382 : vector<8x32xf32>
    %385 = math.tanh %384 : vector<8x32xf32>
    %cst_132 = arith.constant 5.000000e-01 : f32
    %386 = vector.broadcast %cst_132 : f32 to vector<8x32xf32>
    %387 = arith.mulf %386, %385 : vector<8x32xf32>
    %cst_133 = arith.constant 5.000000e-01 : f32
    %388 = vector.broadcast %cst_133 : f32 to vector<8x32xf32>
    %389 = arith.addf %387, %388 : vector<8x32xf32>
    %390 = vector.extract_strided_slice %373 {offsets = [0, 64], sizes = [8, 32], strides = [1, 1]} : vector<8x128xf32> to vector<8x32xf32>
    %391 = math.tanh %390 : vector<8x32xf32>
    %392 = vector.extract_strided_slice %373 {offsets = [0, 96], sizes = [8, 32], strides = [1, 1]} : vector<8x128xf32> to vector<8x32xf32>
    %cst_134 = arith.constant 5.000000e-01 : f32
    %393 = vector.broadcast %cst_134 : f32 to vector<8x32xf32>
    %394 = arith.mulf %393, %392 : vector<8x32xf32>
    %395 = math.tanh %394 : vector<8x32xf32>
    %cst_135 = arith.constant 5.000000e-01 : f32
    %396 = vector.broadcast %cst_135 : f32 to vector<8x32xf32>
    %397 = arith.mulf %396, %395 : vector<8x32xf32>
    %cst_136 = arith.constant 5.000000e-01 : f32
    %398 = vector.broadcast %cst_136 : f32 to vector<8x32xf32>
    %399 = arith.addf %397, %398 : vector<8x32xf32>
    %400 = arith.mulf %389, %329 : vector<8x32xf32>
    %401 = arith.mulf %381, %391 : vector<8x32xf32>
    %402 = arith.addf %400, %401 : vector<8x32xf32>
    %403 = math.tanh %402 : vector<8x32xf32>
    %404 = arith.mulf %399, %403 : vector<8x32xf32>
    %cst_137 = arith.constant dense<0.000000e+00> : vector<8x128xf32>
    %405 = tpu.matmul %404, %4, %cst_137 {dimension_numbers = #tpu.dot_dimension_numbers<[1], [0], [0], [1], [0, 0, 1, 1], [], []>} : vector<8x32xf32>, vector<32x128xf32>, vector<8x128xf32> -> vector<8x128xf32>
    %406 = vector.broadcast %5 : vector<1x128xf32> to vector<8x128xf32>
    %407 = arith.addf %405, %406 : vector<8x128xf32>
    %cst_138 = arith.constant dense<0.000000e+00> : vector<8x128xf32>
    %408 = tpu.matmul %367, %3, %cst_138 {dimension_numbers = #tpu.dot_dimension_numbers<[1], [0], [0], [1], [0, 0, 1, 1], [], []>} : vector<8x32xf32>, vector<32x128xf32>, vector<8x128xf32> -> vector<8x128xf32>
    %409 = arith.addf %407, %408 : vector<8x128xf32>
    %410 = vector.extract_strided_slice %409 {offsets = [0, 0], sizes = [8, 32], strides = [1, 1]} : vector<8x128xf32> to vector<8x32xf32>
    %cst_139 = arith.constant 5.000000e-01 : f32
    %411 = vector.broadcast %cst_139 : f32 to vector<8x32xf32>
    %412 = arith.mulf %411, %410 : vector<8x32xf32>
    %413 = math.tanh %412 : vector<8x32xf32>
    %cst_140 = arith.constant 5.000000e-01 : f32
    %414 = vector.broadcast %cst_140 : f32 to vector<8x32xf32>
    %415 = arith.mulf %414, %413 : vector<8x32xf32>
    %cst_141 = arith.constant 5.000000e-01 : f32
    %416 = vector.broadcast %cst_141 : f32 to vector<8x32xf32>
    %417 = arith.addf %415, %416 : vector<8x32xf32>
    %418 = vector.extract_strided_slice %409 {offsets = [0, 32], sizes = [8, 32], strides = [1, 1]} : vector<8x128xf32> to vector<8x32xf32>
    %cst_142 = arith.constant 5.000000e-01 : f32
    %419 = vector.broadcast %cst_142 : f32 to vector<8x32xf32>
    %420 = arith.mulf %419, %418 : vector<8x32xf32>
    %421 = math.tanh %420 : vector<8x32xf32>
    %cst_143 = arith.constant 5.000000e-01 : f32
    %422 = vector.broadcast %cst_143 : f32 to vector<8x32xf32>
    %423 = arith.mulf %422, %421 : vector<8x32xf32>
    %cst_144 = arith.constant 5.000000e-01 : f32
    %424 = vector.broadcast %cst_144 : f32 to vector<8x32xf32>
    %425 = arith.addf %423, %424 : vector<8x32xf32>
    %426 = vector.extract_strided_slice %409 {offsets = [0, 64], sizes = [8, 32], strides = [1, 1]} : vector<8x128xf32> to vector<8x32xf32>
    %427 = math.tanh %426 : vector<8x32xf32>
    %428 = vector.extract_strided_slice %409 {offsets = [0, 96], sizes = [8, 32], strides = [1, 1]} : vector<8x128xf32> to vector<8x32xf32>
    %cst_145 = arith.constant 5.000000e-01 : f32
    %429 = vector.broadcast %cst_145 : f32 to vector<8x32xf32>
    %430 = arith.mulf %429, %428 : vector<8x32xf32>
    %431 = math.tanh %430 : vector<8x32xf32>
    %cst_146 = arith.constant 5.000000e-01 : f32
    %432 = vector.broadcast %cst_146 : f32 to vector<8x32xf32>
    %433 = arith.mulf %432, %431 : vector<8x32xf32>
    %cst_147 = arith.constant 5.000000e-01 : f32
    %434 = vector.broadcast %cst_147 : f32 to vector<8x32xf32>
    %435 = arith.addf %433, %434 : vector<8x32xf32>
    %436 = arith.mulf %425, %365 : vector<8x32xf32>
    %437 = arith.mulf %417, %427 : vector<8x32xf32>
    %438 = arith.addf %436, %437 : vector<8x32xf32>
    %439 = math.tanh %438 : vector<8x32xf32>
    %440 = arith.mulf %435, %439 : vector<8x32xf32>
    %c5_i32 = arith.constant 5 : i32
    %441 = arith.cmpi eq, %1, %c5_i32 : i32
    %442 = arith.select %441, %440, %369 : vector<8x32xf32>
    %c6 = arith.constant 6 : index
    %c0_148 = arith.constant 0 : index
    %c0_149 = arith.constant 0 : index
    %443 = vector.load %arg2[%c6, %c0_148, %c0_149] : memref<8x8x128xf32, #tpu.memory_space<vmem>>, vector<1x8x128xf32>
    %444 = vector.shape_cast %443 : vector<1x8x128xf32> to vector<8x128xf32>
    %cst_150 = arith.constant dense<0.000000e+00> : vector<8x128xf32>
    %445 = tpu.matmul %404, %2, %cst_150 {dimension_numbers = #tpu.dot_dimension_numbers<[1], [0], [0], [1], [0, 0, 1, 1], [], []>} : vector<8x32xf32>, vector<32x128xf32>, vector<8x128xf32> -> vector<8x128xf32>
    %446 = arith.addf %444, %445 : vector<8x128xf32>
    %447 = vector.extract_strided_slice %446 {offsets = [0, 0], sizes = [8, 32], strides = [1, 1]} : vector<8x128xf32> to vector<8x32xf32>
    %cst_151 = arith.constant 5.000000e-01 : f32
    %448 = vector.broadcast %cst_151 : f32 to vector<8x32xf32>
    %449 = arith.mulf %448, %447 : vector<8x32xf32>
    %450 = math.tanh %449 : vector<8x32xf32>
    %cst_152 = arith.constant 5.000000e-01 : f32
    %451 = vector.broadcast %cst_152 : f32 to vector<8x32xf32>
    %452 = arith.mulf %451, %450 : vector<8x32xf32>
    %cst_153 = arith.constant 5.000000e-01 : f32
    %453 = vector.broadcast %cst_153 : f32 to vector<8x32xf32>
    %454 = arith.addf %452, %453 : vector<8x32xf32>
    %455 = vector.extract_strided_slice %446 {offsets = [0, 32], sizes = [8, 32], strides = [1, 1]} : vector<8x128xf32> to vector<8x32xf32>
    %cst_154 = arith.constant 5.000000e-01 : f32
    %456 = vector.broadcast %cst_154 : f32 to vector<8x32xf32>
    %457 = arith.mulf %456, %455 : vector<8x32xf32>
    %458 = math.tanh %457 : vector<8x32xf32>
    %cst_155 = arith.constant 5.000000e-01 : f32
    %459 = vector.broadcast %cst_155 : f32 to vector<8x32xf32>
    %460 = arith.mulf %459, %458 : vector<8x32xf32>
    %cst_156 = arith.constant 5.000000e-01 : f32
    %461 = vector.broadcast %cst_156 : f32 to vector<8x32xf32>
    %462 = arith.addf %460, %461 : vector<8x32xf32>
    %463 = vector.extract_strided_slice %446 {offsets = [0, 64], sizes = [8, 32], strides = [1, 1]} : vector<8x128xf32> to vector<8x32xf32>
    %464 = math.tanh %463 : vector<8x32xf32>
    %465 = vector.extract_strided_slice %446 {offsets = [0, 96], sizes = [8, 32], strides = [1, 1]} : vector<8x128xf32> to vector<8x32xf32>
    %cst_157 = arith.constant 5.000000e-01 : f32
    %466 = vector.broadcast %cst_157 : f32 to vector<8x32xf32>
    %467 = arith.mulf %466, %465 : vector<8x32xf32>
    %468 = math.tanh %467 : vector<8x32xf32>
    %cst_158 = arith.constant 5.000000e-01 : f32
    %469 = vector.broadcast %cst_158 : f32 to vector<8x32xf32>
    %470 = arith.mulf %469, %468 : vector<8x32xf32>
    %cst_159 = arith.constant 5.000000e-01 : f32
    %471 = vector.broadcast %cst_159 : f32 to vector<8x32xf32>
    %472 = arith.addf %470, %471 : vector<8x32xf32>
    %473 = arith.mulf %462, %402 : vector<8x32xf32>
    %474 = arith.mulf %454, %464 : vector<8x32xf32>
    %475 = arith.addf %473, %474 : vector<8x32xf32>
    %476 = math.tanh %475 : vector<8x32xf32>
    %477 = arith.mulf %472, %476 : vector<8x32xf32>
    %cst_160 = arith.constant dense<0.000000e+00> : vector<8x128xf32>
    %478 = tpu.matmul %477, %4, %cst_160 {dimension_numbers = #tpu.dot_dimension_numbers<[1], [0], [0], [1], [0, 0, 1, 1], [], []>} : vector<8x32xf32>, vector<32x128xf32>, vector<8x128xf32> -> vector<8x128xf32>
    %479 = vector.broadcast %5 : vector<1x128xf32> to vector<8x128xf32>
    %480 = arith.addf %478, %479 : vector<8x128xf32>
    %cst_161 = arith.constant dense<0.000000e+00> : vector<8x128xf32>
    %481 = tpu.matmul %440, %3, %cst_161 {dimension_numbers = #tpu.dot_dimension_numbers<[1], [0], [0], [1], [0, 0, 1, 1], [], []>} : vector<8x32xf32>, vector<32x128xf32>, vector<8x128xf32> -> vector<8x128xf32>
    %482 = arith.addf %480, %481 : vector<8x128xf32>
    %483 = vector.extract_strided_slice %482 {offsets = [0, 0], sizes = [8, 32], strides = [1, 1]} : vector<8x128xf32> to vector<8x32xf32>
    %cst_162 = arith.constant 5.000000e-01 : f32
    %484 = vector.broadcast %cst_162 : f32 to vector<8x32xf32>
    %485 = arith.mulf %484, %483 : vector<8x32xf32>
    %486 = math.tanh %485 : vector<8x32xf32>
    %cst_163 = arith.constant 5.000000e-01 : f32
    %487 = vector.broadcast %cst_163 : f32 to vector<8x32xf32>
    %488 = arith.mulf %487, %486 : vector<8x32xf32>
    %cst_164 = arith.constant 5.000000e-01 : f32
    %489 = vector.broadcast %cst_164 : f32 to vector<8x32xf32>
    %490 = arith.addf %488, %489 : vector<8x32xf32>
    %491 = vector.extract_strided_slice %482 {offsets = [0, 32], sizes = [8, 32], strides = [1, 1]} : vector<8x128xf32> to vector<8x32xf32>
    %cst_165 = arith.constant 5.000000e-01 : f32
    %492 = vector.broadcast %cst_165 : f32 to vector<8x32xf32>
    %493 = arith.mulf %492, %491 : vector<8x32xf32>
    %494 = math.tanh %493 : vector<8x32xf32>
    %cst_166 = arith.constant 5.000000e-01 : f32
    %495 = vector.broadcast %cst_166 : f32 to vector<8x32xf32>
    %496 = arith.mulf %495, %494 : vector<8x32xf32>
    %cst_167 = arith.constant 5.000000e-01 : f32
    %497 = vector.broadcast %cst_167 : f32 to vector<8x32xf32>
    %498 = arith.addf %496, %497 : vector<8x32xf32>
    %499 = vector.extract_strided_slice %482 {offsets = [0, 64], sizes = [8, 32], strides = [1, 1]} : vector<8x128xf32> to vector<8x32xf32>
    %500 = math.tanh %499 : vector<8x32xf32>
    %501 = vector.extract_strided_slice %482 {offsets = [0, 96], sizes = [8, 32], strides = [1, 1]} : vector<8x128xf32> to vector<8x32xf32>
    %cst_168 = arith.constant 5.000000e-01 : f32
    %502 = vector.broadcast %cst_168 : f32 to vector<8x32xf32>
    %503 = arith.mulf %502, %501 : vector<8x32xf32>
    %504 = math.tanh %503 : vector<8x32xf32>
    %cst_169 = arith.constant 5.000000e-01 : f32
    %505 = vector.broadcast %cst_169 : f32 to vector<8x32xf32>
    %506 = arith.mulf %505, %504 : vector<8x32xf32>
    %cst_170 = arith.constant 5.000000e-01 : f32
    %507 = vector.broadcast %cst_170 : f32 to vector<8x32xf32>
    %508 = arith.addf %506, %507 : vector<8x32xf32>
    %509 = arith.mulf %498, %438 : vector<8x32xf32>
    %510 = arith.mulf %490, %500 : vector<8x32xf32>
    %511 = arith.addf %509, %510 : vector<8x32xf32>
    %512 = math.tanh %511 : vector<8x32xf32>
    %513 = arith.mulf %508, %512 : vector<8x32xf32>
    %c6_i32 = arith.constant 6 : i32
    %514 = arith.cmpi eq, %1, %c6_i32 : i32
    %515 = arith.select %514, %513, %442 : vector<8x32xf32>
    %c7 = arith.constant 7 : index
    %c0_171 = arith.constant 0 : index
    %c0_172 = arith.constant 0 : index
    %516 = vector.load %arg2[%c7, %c0_171, %c0_172] : memref<8x8x128xf32, #tpu.memory_space<vmem>>, vector<1x8x128xf32>
    %517 = vector.shape_cast %516 : vector<1x8x128xf32> to vector<8x128xf32>
    %cst_173 = arith.constant dense<0.000000e+00> : vector<8x128xf32>
    %518 = tpu.matmul %477, %2, %cst_173 {dimension_numbers = #tpu.dot_dimension_numbers<[1], [0], [0], [1], [0, 0, 1, 1], [], []>} : vector<8x32xf32>, vector<32x128xf32>, vector<8x128xf32> -> vector<8x128xf32>
    %519 = arith.addf %517, %518 : vector<8x128xf32>
    %520 = vector.extract_strided_slice %519 {offsets = [0, 0], sizes = [8, 32], strides = [1, 1]} : vector<8x128xf32> to vector<8x32xf32>
    %cst_174 = arith.constant 5.000000e-01 : f32
    %521 = vector.broadcast %cst_174 : f32 to vector<8x32xf32>
    %522 = arith.mulf %521, %520 : vector<8x32xf32>
    %523 = math.tanh %522 : vector<8x32xf32>
    %cst_175 = arith.constant 5.000000e-01 : f32
    %524 = vector.broadcast %cst_175 : f32 to vector<8x32xf32>
    %525 = arith.mulf %524, %523 : vector<8x32xf32>
    %cst_176 = arith.constant 5.000000e-01 : f32
    %526 = vector.broadcast %cst_176 : f32 to vector<8x32xf32>
    %527 = arith.addf %525, %526 : vector<8x32xf32>
    %528 = vector.extract_strided_slice %519 {offsets = [0, 32], sizes = [8, 32], strides = [1, 1]} : vector<8x128xf32> to vector<8x32xf32>
    %cst_177 = arith.constant 5.000000e-01 : f32
    %529 = vector.broadcast %cst_177 : f32 to vector<8x32xf32>
    %530 = arith.mulf %529, %528 : vector<8x32xf32>
    %531 = math.tanh %530 : vector<8x32xf32>
    %cst_178 = arith.constant 5.000000e-01 : f32
    %532 = vector.broadcast %cst_178 : f32 to vector<8x32xf32>
    %533 = arith.mulf %532, %531 : vector<8x32xf32>
    %cst_179 = arith.constant 5.000000e-01 : f32
    %534 = vector.broadcast %cst_179 : f32 to vector<8x32xf32>
    %535 = arith.addf %533, %534 : vector<8x32xf32>
    %536 = vector.extract_strided_slice %519 {offsets = [0, 64], sizes = [8, 32], strides = [1, 1]} : vector<8x128xf32> to vector<8x32xf32>
    %537 = math.tanh %536 : vector<8x32xf32>
    %538 = vector.extract_strided_slice %519 {offsets = [0, 96], sizes = [8, 32], strides = [1, 1]} : vector<8x128xf32> to vector<8x32xf32>
    %cst_180 = arith.constant 5.000000e-01 : f32
    %539 = vector.broadcast %cst_180 : f32 to vector<8x32xf32>
    %540 = arith.mulf %539, %538 : vector<8x32xf32>
    %541 = math.tanh %540 : vector<8x32xf32>
    %cst_181 = arith.constant 5.000000e-01 : f32
    %542 = vector.broadcast %cst_181 : f32 to vector<8x32xf32>
    %543 = arith.mulf %542, %541 : vector<8x32xf32>
    %cst_182 = arith.constant 5.000000e-01 : f32
    %544 = vector.broadcast %cst_182 : f32 to vector<8x32xf32>
    %545 = arith.addf %543, %544 : vector<8x32xf32>
    %546 = arith.mulf %535, %475 : vector<8x32xf32>
    %547 = arith.mulf %527, %537 : vector<8x32xf32>
    %548 = arith.addf %546, %547 : vector<8x32xf32>
    %549 = math.tanh %548 : vector<8x32xf32>
    %550 = arith.mulf %545, %549 : vector<8x32xf32>
    %cst_183 = arith.constant dense<0.000000e+00> : vector<8x128xf32>
    %551 = tpu.matmul %550, %4, %cst_183 {dimension_numbers = #tpu.dot_dimension_numbers<[1], [0], [0], [1], [0, 0, 1, 1], [], []>} : vector<8x32xf32>, vector<32x128xf32>, vector<8x128xf32> -> vector<8x128xf32>
    %552 = vector.broadcast %5 : vector<1x128xf32> to vector<8x128xf32>
    %553 = arith.addf %551, %552 : vector<8x128xf32>
    %cst_184 = arith.constant dense<0.000000e+00> : vector<8x128xf32>
    %554 = tpu.matmul %513, %3, %cst_184 {dimension_numbers = #tpu.dot_dimension_numbers<[1], [0], [0], [1], [0, 0, 1, 1], [], []>} : vector<8x32xf32>, vector<32x128xf32>, vector<8x128xf32> -> vector<8x128xf32>
    %555 = arith.addf %553, %554 : vector<8x128xf32>
    %556 = vector.extract_strided_slice %555 {offsets = [0, 0], sizes = [8, 32], strides = [1, 1]} : vector<8x128xf32> to vector<8x32xf32>
    %cst_185 = arith.constant 5.000000e-01 : f32
    %557 = vector.broadcast %cst_185 : f32 to vector<8x32xf32>
    %558 = arith.mulf %557, %556 : vector<8x32xf32>
    %559 = math.tanh %558 : vector<8x32xf32>
    %cst_186 = arith.constant 5.000000e-01 : f32
    %560 = vector.broadcast %cst_186 : f32 to vector<8x32xf32>
    %561 = arith.mulf %560, %559 : vector<8x32xf32>
    %cst_187 = arith.constant 5.000000e-01 : f32
    %562 = vector.broadcast %cst_187 : f32 to vector<8x32xf32>
    %563 = arith.addf %561, %562 : vector<8x32xf32>
    %564 = vector.extract_strided_slice %555 {offsets = [0, 32], sizes = [8, 32], strides = [1, 1]} : vector<8x128xf32> to vector<8x32xf32>
    %cst_188 = arith.constant 5.000000e-01 : f32
    %565 = vector.broadcast %cst_188 : f32 to vector<8x32xf32>
    %566 = arith.mulf %565, %564 : vector<8x32xf32>
    %567 = math.tanh %566 : vector<8x32xf32>
    %cst_189 = arith.constant 5.000000e-01 : f32
    %568 = vector.broadcast %cst_189 : f32 to vector<8x32xf32>
    %569 = arith.mulf %568, %567 : vector<8x32xf32>
    %cst_190 = arith.constant 5.000000e-01 : f32
    %570 = vector.broadcast %cst_190 : f32 to vector<8x32xf32>
    %571 = arith.addf %569, %570 : vector<8x32xf32>
    %572 = vector.extract_strided_slice %555 {offsets = [0, 64], sizes = [8, 32], strides = [1, 1]} : vector<8x128xf32> to vector<8x32xf32>
    %573 = math.tanh %572 : vector<8x32xf32>
    %574 = vector.extract_strided_slice %555 {offsets = [0, 96], sizes = [8, 32], strides = [1, 1]} : vector<8x128xf32> to vector<8x32xf32>
    %cst_191 = arith.constant 5.000000e-01 : f32
    %575 = vector.broadcast %cst_191 : f32 to vector<8x32xf32>
    %576 = arith.mulf %575, %574 : vector<8x32xf32>
    %577 = math.tanh %576 : vector<8x32xf32>
    %cst_192 = arith.constant 5.000000e-01 : f32
    %578 = vector.broadcast %cst_192 : f32 to vector<8x32xf32>
    %579 = arith.mulf %578, %577 : vector<8x32xf32>
    %cst_193 = arith.constant 5.000000e-01 : f32
    %580 = vector.broadcast %cst_193 : f32 to vector<8x32xf32>
    %581 = arith.addf %579, %580 : vector<8x32xf32>
    %582 = arith.mulf %571, %511 : vector<8x32xf32>
    %583 = arith.mulf %563, %573 : vector<8x32xf32>
    %584 = arith.addf %582, %583 : vector<8x32xf32>
    %585 = math.tanh %584 : vector<8x32xf32>
    %586 = arith.mulf %581, %585 : vector<8x32xf32>
    %c7_i32 = arith.constant 7 : i32
    %587 = arith.cmpi eq, %1, %c7_i32 : i32
    %588 = arith.select %587, %586, %515 : vector<8x32xf32>
    %c0_194 = arith.constant 0 : index
    %c0_195 = arith.constant 0 : index
    %589 = vector.load %arg7[%c0_194, %c0_195] : memref<32x50xf32, #tpu.memory_space<vmem>>, vector<32x50xf32>
    %cst_196 = arith.constant dense<0.000000e+00> : vector<8x50xf32>
    %590 = tpu.matmul %588, %589, %cst_196 {dimension_numbers = #tpu.dot_dimension_numbers<[1], [0], [0], [1], [0, 0, 1, 1], [], []>} : vector<8x32xf32>, vector<32x50xf32>, vector<8x50xf32> -> vector<8x50xf32>
    %c0_197 = arith.constant 0 : index
    %c0_198 = arith.constant 0 : index
    %591 = vector.load %arg8[%c0_197, %c0_198] : memref<1x50xf32, #tpu.memory_space<vmem>>, vector<1x50xf32>
    %592 = vector.broadcast %591 : vector<1x50xf32> to vector<8x50xf32>
    %593 = arith.addf %590, %592 : vector<8x50xf32>
    %cst_199 = arith.constant 0.000000e+00 : f32
    %594 = vector.broadcast %cst_199 : f32 to vector<8x50xf32>
    %595 = arith.maximumf %593, %594 : vector<8x50xf32>
    %c0_200 = arith.constant 0 : index
    %c0_201 = arith.constant 0 : index
    %596 = vector.load %arg9[%c0_200, %c0_201] : memref<50x4xf32, #tpu.memory_space<vmem>>, vector<50x4xf32>
    %cst_202 = arith.constant dense<0.000000e+00> : vector<8x4xf32>
    %597 = tpu.matmul %595, %596, %cst_202 {dimension_numbers = #tpu.dot_dimension_numbers<[1], [0], [0], [1], [0, 0, 1, 1], [], []>} : vector<8x50xf32>, vector<50x4xf32>, vector<8x4xf32> -> vector<8x4xf32>
    %c0_203 = arith.constant 0 : index
    %c0_204 = arith.constant 0 : index
    %598 = vector.load %arg10[%c0_203, %c0_204] : memref<1x4xf32, #tpu.memory_space<vmem>>, vector<1x4xf32>
    %599 = vector.broadcast %598 : vector<1x4xf32> to vector<8x4xf32>
    %600 = arith.addf %597, %599 : vector<8x4xf32>
    %c0_205 = arith.constant 0 : index
    %c0_206 = arith.constant 0 : index
    %601 = vector.load %arg11[%c0_205, %c0_206] : memref<8x4xf32, #tpu.memory_space<vmem>>, vector<8x4xf32>
    tpu.vector_store %arg11[%c0_205, %c0_206], %600 {strides = array<i32>} : memref<8x4xf32, #tpu.memory_space<vmem>>, vector<8x4xf32>,
    return
  }
  func.func @transform_0(%arg0: i32, %arg1: memref<2xi32, #tpu.memory_space<smem>>) -> (i32, i32, i32) {
    %c0_i32 = arith.constant 0 : i32
    %c0_i32_0 = arith.constant 0 : i32
    %c0_i32_1 = arith.constant 0 : i32
    return %c0_i32, %arg0, %c0_i32_0 : i32, i32, i32
  }
  func.func @transform_1(%arg0: i32, %arg1: memref<2xi32, #tpu.memory_space<smem>>) -> (i32, i32) {
    %c0_i32 = arith.constant 0 : i32
    %c0_i32_0 = arith.constant 0 : i32
    %c0_i32_1 = arith.constant 0 : i32
    return %c0_i32, %c0_i32_0 : i32, i32
  }
  func.func @transform_2(%arg0: i32, %arg1: memref<2xi32, #tpu.memory_space<smem>>) -> (i32, i32) {
    %c0_i32 = arith.constant 0 : i32
    %c0_i32_0 = arith.constant 0 : i32
    %c0_i32_1 = arith.constant 0 : i32
    return %c0_i32, %c0_i32_0 : i32, i32
  }
  func.func @transform_3(%arg0: i32, %arg1: memref<2xi32, #tpu.memory_space<smem>>) -> (i32, i32) {
    %c0_i32 = arith.constant 0 : i32
    %c0_i32_0 = arith.constant 0 : i32
    %c0_i32_1 = arith.constant 0 : i32
    return %c0_i32, %c0_i32_0 : i32, i32
  }
  func.func @transform_4(%arg0: i32, %arg1: memref<2xi32, #tpu.memory_space<smem>>) -> (i32, i32) {
    %c0_i32 = arith.constant 0 : i32
    %c0_i32_0 = arith.constant 0 : i32
    %c0_i32_1 = arith.constant 0 : i32
    return %c0_i32, %c0_i32_0 : i32, i32
  }
  func.func @transform_5(%arg0: i32, %arg1: memref<2xi32, #tpu.memory_space<smem>>) -> (i32, i32) {
    %c0_i32 = arith.constant 0 : i32
    %c0_i32_0 = arith.constant 0 : i32
    %c0_i32_1 = arith.constant 0 : i32
    return %c0_i32, %c0_i32_0 : i32, i32
  }
  func.func @transform_6(%arg0: i32, %arg1: memref<2xi32, #tpu.memory_space<smem>>) -> (i32, i32) {
    %c0_i32 = arith.constant 0 : i32
    %c0_i32_0 = arith.constant 0 : i32
    %c0_i32_1 = arith.constant 0 : i32
    return %c0_i32, %c0_i32_0 : i32, i32
  }
  func.func @transform_7(%arg0: i32, %arg1: memref<2xi32, #tpu.memory_space<smem>>) -> (i32, i32) {
    %c0_i32 = arith.constant 0 : i32
    %c0_i32_0 = arith.constant 0 : i32
    %c0_i32_1 = arith.constant 0 : i32
    return %c0_i32, %c0_i32_0 : i32, i32
  }
  func.func @transform_8(%arg0: i32, %arg1: memref<2xi32, #tpu.memory_space<smem>>) -> (i32, i32) {
    %c0_i32 = arith.constant 0 : i32
    %c0_i32_0 = arith.constant 0 : i32
    %c0_i32_1 = arith.constant 0 : i32
    return %c0_i32, %c0_i32_0 : i32, i32
  }
  func.func @transform_9(%arg0: i32, %arg1: memref<2xi32, #tpu.memory_space<smem>>) -> (i32, i32) {
    %c0_i32 = arith.constant 0 : i32
    %c0_i32_0 = arith.constant 0 : i32
    return %arg0, %c0_i32 : i32, i32
  }
}

</mosaic_0001>

<bundles_post_ra>
// kernel: tpu_custom_call.1
= control target key start
LH: loop header
LB: loop body
LE: loop exit
PB: predicated region body
PF: predicated region fallthrough
CT: control target
= control target key end

     0   :  { %s3647_s0 = inlined_call_operand.vmem [shape: s32[2], index: 0, kind: input, shape index: {}]   ;;  %s3648_s1 = inlined_call_operand.hbm [shape: f32[8,8,128], index: 1, kind: input, shape index: {}]   ;;  %s3649_s2 = inlined_call_operand.vmem [shape: f32[32,128], index: 2, kind: input, shape index: {}]   ;;  %s3650_s3 = inlined_call_operand.vmem [shape: f32[32,128], index: 3, kind: input, shape index: {}]   ;;  %s3651_s4 = inlined_call_operand.hbm [shape: f32[32,128], index: 4, kind: input, shape index: {}]   ;;  %s3652_s5 = inlined_call_operand.vmem [shape: f32[1,128], index: 5, kind: input, shape index: {}]   ;;  %s3653_s6 = inlined_call_operand.hbm [shape: f32[32,50], index: 6, kind: input, shape index: {}]   ;;  %s3654_s7 = inlined_call_operand.vmem [shape: f32[1,50], index: 7, kind: input, shape index: {}]   ;;  %s3655_s8 = inlined_call_operand.vmem [shape: f32[50,4], index: 8, kind: input, shape index: {}]   ;;  %s3656_s9 = inlined_call_operand.vmem [shape: f32[1,4], index: 9, kind: input, shape index: {}]   ;;  %s3657_s10 = inlined_call_operand.vmem [shape: f32[8,4], index: 10, kind: output, shape index: {}]  }
   0x1   :  { %s15_s15 = sshll.u32 %s3647_s0, 4  ;;  %s16_s15 = int_to_ptr.vmem [resolvable:$true] %s15_s15 }
   0x2   :  { %s3023_s16 = scalar_lea.vmem %s16_s15, 16  ;;  %p3028_p1 = scmp.lt.s32.totalorder %s16_s15, %s16_s15 }
   0x3   :  { %p3024_p0 = scmp.ne.s32.totalorder %s16_s15, %s3023_s16  ;;  %p3029_p2 = scmp.lt.s32.totalorder %s3023_s16, %s3023_s16 }
   0x5   :  { %p3030_p3 = por %p3029_p2, %p3028_p1 }
   0x7   :  { %p3031_p4 = pnand %p3030_p3, %p3024_p0 }
   0x9   :  { %3034 = shalt.err (!%p3031_p4)  }
   0xa   :  { %s3107_s17 = smov [#allocation3]  }
   0xb   :  { %18 = dma.vmem_to_smem %s16_s15, 16, %s3107_s17, [#allocation2] }
   0xc   :  { %3101 = dma.done.wait [#allocation2], 16 }
   0xd   :  { %3102 = vsyncadd [#allocation2], 4294967280 }
   0xe   :  { %20 = sfence }
   0xf   :  { %21 = vsyncpa [#allocation5], 0 }
  0x10   :  { %22 = vsyncpa [#allocation7], 0  ;;  %s3108_s18 = smov [#allocation6]   ;;  %s3109_s20 = smov [#allocation4]  }
  0x11   :  { %s44_s19 = sshll.u32 %s3108_s18, 4  ;;  %s28_s21 = sshll.u32 %s3109_s20, 4  ;;  %s45_s19 = int_to_ptr.vmem [resolvable:$true] %s44_s19  ;;  %s3176_s21 = int_to_ptr.vmem [resolvable:$true] %s28_s21 }
  0x12   :  { %s3035_s23 = scalar_lea.hbm %s3651_s4, 512 }
  0x13   :  { %p3036_p5 = scmp.ne.s32.totalorder %s3651_s4, %s3035_s23  ;;  %p3039_p6 = scmp.lt.u32.totalorder %s3035_s23, %s3651_s4 }
  0x15   :  { %p3041_p7 = pnand %p3039_p6, %p3036_p5 }
  0x17   :  { %3044 = shalt.err (!%p3041_p7)
}
  0x18   :  { %s3045_s28 = scalar_lea.vmem %s45_s19, 512  ;;  %p3050_p9 = scmp.lt.s32.totalorder %s45_s19, %s45_s19 }
  0x19   :  { %p3046_p8 = scmp.ne.s32.totalorder %s45_s19, %s3045_s28  ;;  %p3051_p10 = scmp.lt.s32.totalorder %s3045_s28, %s3045_s28 }
  0x1b   :  { %p3052_p11 = por %p3051_p10, %p3050_p9 }
  0x1d   :  { %p3053_p12 = pnand %p3052_p11, %p3046_p8 }
  0x1f   :  { %3056 = shalt.err (!%p3053_p12)
}
  0x20   :  { %s3110_s29 = smov 128   ;;  %s3111_s30 = smov 8  }
  0x21   :  { %50 = dma.hbm_to_vmem [thread:$0]  %s3651_s4, 512, %s45_s19, [#allocation7], %s3110_s29, %s3110_s29, %s3111_s30  }
  0x22   :  { %s3057_s15 = scalar_lea.hbm %s3648_s1, 1024 }
  0x23   :  { %p3058_p13 = scmp.ne.s32.totalorder %s3648_s1, %s3057_s15  ;;  %p3061_p0 = scmp.lt.u32.totalorder %s3057_s15, %s3648_s1 }
  0x25   :  { %p3063_p1 = pnand %p3061_p0, %p3058_p13 }
  0x27   :  { %3066 = shalt.err (!%p3063_p1)
}
  0x28   :  { %s3067_s0 = scalar_lea.vmem %s3176_s21, 1024  ;;  %p3072_p3 = scmp.lt.s32.totalorder %s3176_s21, %s3176_s21 }
  0x29   :  { %p3068_p2 = scmp.ne.s32.totalorder %s3176_s21, %s3067_s0  ;;  %p3073_p4 = scmp.lt.s32.totalorder %s3067_s0, %s3067_s0 }
  0x2b   :  { %p3074_p5 = por %p3073_p4, %p3072_p3 }
  0x2d   :  { %p3075_p6 = pnand %p3074_p5, %p3068_p2 }
  0x2f   :  { %3078 = shalt.err (!%p3075_p6)
}
  0x30   :  { %34 = dma.hbm_to_vmem [thread:$0]  %s3648_s1, 1024, %s3176_s21, [#allocation5], %s3110_s29, %s3110_s29, %s3111_s30  }
  0x31   :  { %s3112_s22 = smov [#allocation8]   ;;  %s3079_s26 = scalar_lea.hbm %s3653_s6, 512 }
  0x32   :  { %s58_s23 = sshll.u32 %s3112_s22, 4  ;;  %p3080_p7 = scmp.ne.s32.totalorder %s3653_s6, %s3079_s26  ;;  %s59_s23 = int_to_ptr.vmem [resolvable:$true] %s58_s23 }
  0x33   :  { %p3083_p8 = scmp.lt.u32.totalorder %s3079_s26, %s3653_s6 }
  0x35   :  { %p3085_p9 = pnand %p3083_p8, %p3080_p7 }
  0x37   :  { %3088 = shalt.err (!%p3085_p9)
}
  0x38   :  { %s3089_s13 = scalar_lea.vmem %s59_s23, 512  ;;  %p3094_p11 = scmp.lt.s32.totalorder %s59_s23, %s59_s23 }
  0x39   :  { %p3090_p10 = scmp.ne.s32.totalorder %s59_s23, %s3089_s13  ;;  %p3095_p12 = scmp.lt.s32.totalorder %s3089_s13, %s3089_s13 }
  0x3b   :  { %p3096_p13 = por %p3095_p12, %p3094_p11 }
  0x3d   :  { %p3097_p0 = pnand %p3096_p13, %p3090_p10 }
  0x3f   :  { %3100 = shalt.err (!%p3097_p0)
}
  0x40   :  { %64 = dma.hbm_to_vmem [thread:$0]  %s3653_s6, 512, %s59_s23, [#allocation7], %s3110_s29, %s3110_s29, %s3111_s30  }
  0x41   :  { %3103 = dma.done.wait [#allocation5], 1024  }
  0x42   :  { %3104 = vsyncadd [#allocation5], 4294966272 }
  0x43   :  { %3105 = dma.done.wait [#allocation7], 1024  }
  0x44   :  { %3106 = vsyncadd [#allocation7], 4294966272  ;;  %v95_v0 = vld [vmem:[#allocation4] sm:$0xff]  ;;  %s3113_s14 = smov 64   ;;  %s3114_s15 = smov 32   ;;  %v91_v12 = vld [vmem:[#allocation6 + $0x8] sm:$0xff] }
  0x45   :  { %2927 = vtanh.f32 %v95_v0  ;;  %v96_v2 = vmul.f32 0.5, %v95_v0  ;;  %v90_v11 = vld [vmem:[#allocation6] sm:$0xff]  ;;  %v3115_v14 = vmov 0.0|0.0   ;;  %v83_v16 = vld [vmem:[%s3649_s2 + $0x8] sm:$0xff]  ;;  %v92_v17 = vld [vmem:[#allocation6 + $0x10] sm:$0xff]  ;;  %vm3116_vm0 = vmmov 0  }
  0x46   :  { %v82_v13 = vld [vmem:[%s3649_s2] sm:$0xff]  ;;  %2748 = vmatprep.subr.bf16.mxu0 %v3115_v14  ;;  %2754 = vmatprep.subr.bf16.mxu1 %v3115_v14  ;;  %v3238_v15 = vpack.c.bf16 %v91_v12, %v90_v11  ;;  %v93_v18 = vld [vmem:[#allocation6 + $0x18] sm:$0xff]  ;;  %v84_v20 = vld [vmem:[%s3649_s2 + $0x10] sm:$0xff]  ;;  %v3117_v22 = vmov 0.0   ;;  %vm127_vm1 = vcmask 261120   ;;  %vm2243_vm10 = vcmask 1041408  }
  0x47   :  { %2929 = vtanh.f32 %v96_v2  ;;  %v3243_v19 = vpack.c.bf16 %v83_v16, %v82_v13  ;;  %v85_v21 = vld [vmem:[%s3649_s2 + $0x18] sm:$0xff]  ;;  %2486 = vmatprep.mubr.msk.f32.mxu0 %vm3116_vm0, %v3117_v22  ;;  %2497 = vmatprep.mubr.msk.f32.mxu1 %vm3116_vm0, %v3117_v22  ;;  %v3256_v23 = vpack.c.bf16 %v93_v18, %v92_v17  ;;  %v3286_v29 = vld [vmem:[%s3652_s5] ss:$0 sm:$0xff]  ;;  %v228_v30 = vld [vmem:[#allocation4 + $0x8] sm:$0xff]  ;;  %vm2239_vm11 = vcmask 408576  }
  0x48   :  { %2750 = vmatpush3.bf16.msra.mxu0 %v3238_v15  ;;  %v3260_v24 = vpack.c.bf16 %v85_v21, %v84_v20  ;;  %v86_v63 = vld [vmem:[%s3650_s3] sm:$0xff]  ;;  %v87_v0 = vld [vmem:[%s3650_s3 + $0x8] sm:$0xff]  ;;  %v88_v2 = vld [vmem:[%s3650_s3 + $0x10] sm:$0xff]  ;;  %vm2317_vm12 = vcmask 31744  }
  0x49   :  { %2756 = vmatpush3.bf16.msra.mxu1 %v3243_v19  ;;  %2751 = vmatprep.subr.bf16.mxu0 %v3115_v14 }
  0x4a   :  { %2757 = vmatprep.subr.bf16.mxu1 %v3115_v14 }
  0x4c   :  { %2753 = vmatpush3.bf16.msra.mxu0 %v3256_v23 }
  0x4d   :  { %2759 = vmatpush3.bf16.msra.mxu1 %v3260_v24  ;;  %2760 = vmatprep.subr.bf16.mxu0 %v3115_v14 }
  0x4e   :  { %2772 = vmatprep.subr.bf16.mxu1 %v3115_v14 }
  0x4f   :  { %v2928_v1 = vpop.eup %2927 }
  0x50   :  { %103 = vrot.lane.b32.xlu0 %v2928_v1, %s3113_s14  ;;  %v3313_v1 = vpack.c.bf16 %v87_v0, %v86_v63 }
  0x51   :  { %v2930_v3 = vpop.eup %2929 }
  0x52   :  { %v98_v4 = vmul.f32 0.5, %v2930_v3  ;;  %v89_v3 = vld [vmem:[%s3650_s3 + $0x18] sm:$0xff]  ;;  %s2325_s3 = sld [smem:[#allocation3 + $0x1]] }
  0x54   :  { %v99_v5 = vadd.f32 0.5, %v98_v4 }
  0x56   :  { %v101_v8 = vmul.f32 0.0, %v99_v5 }
  0x58   :  { %s3359_s28 = sadd.s32 4294967295, %s2325_s3 }
  0x59   :  { %p222_p1 = scmp.eq.s32.totalorder %s3359_s28, 0  ;;  %p495_p2 = scmp.eq.s32.totalorder %s3359_s28, 1 }
  0x5a   :  { %p768_p3 = scmp.eq.s32.totalorder %s3359_s28, 2  ;;  %p1041_p4 = scmp.eq.s32.totalorder %s3359_s28, 3 }
  0x5b   :  { %s223_s11 = scalar_select %p222_p1, 1, 0 }
  0x5c   :  { %s496_s12 = scalar_select %p495_p2, 1, 0 }
  0x5d   :  { %s769_s13 = scalar_select %p768_p3, 1, 0 }
  0x5e   :  { %s1042_s1 = scalar_select %p1041_p4, 1, 0 }
  0x5f   :  { %p1314_p5 = scmp.eq.s32.totalorder %s3359_s28, 4  ;;  %p1587_p6 = scmp.eq.s32.totalorder %s3359_s28, 5 }
  0x60   :  { %p1860_p7 = scmp.eq.s32.totalorder %s3359_s28, 6  ;;  %p2133_p8 = scmp.eq.s32.totalorder %s3359_s28, 7 }
  0x61   :  { %s1315_s21 = scalar_select %p1314_p5, 1, 0 }
  0x62   :  { %s1588_s6 = scalar_select %p1587_p6, 1, 0 }
  0x63   :  { %s1861_s29 = scalar_select %p1860_p7, 1, 0 }
  0x64   :  { %s2134_s30 = scalar_select %p2133_p8, 1, 0 }
  0xc2   :  { %v104_v6 = vpop.permute.xlu0 %103 }
  0xc3   :  { %v106_v7 = vmul.f32 %v104_v6, %v99_v5 }
  0xc5   :  { %108 = vrot.lane.b32.xlu0 %v106_v7, %s3114_s15  ;;  %v501_v7 = vld [vmem:[#allocation4 + $0x10] sm:$0xff] }
 0x137   :  { %v109_v9 = vpop.permute.xlu0 %108 }
 0x138   :  { %v3230_v10 = vadd.f32 %v109_v9, %v101_v8 }
 0x13a   :  { %2931 = vtanh.f32 %v3230_v10 }
 0x144   :  { %v2932_v25 = vpop.eup %2931 }
 0x145   :  { %114 = vrot.lane.b32.xlu1 %v2932_v25, %s3113_s14 }
 0x1b7   :  { %v115_v26 = vpop.permute.xlu1 %114 }
 0x1b8   :  { %v117_v27 = vmul.f32 %v115_v26, %v99_v5  ;;  %v3324_v5 = vpack.c.bf16 %v89_v3, %v88_v2 }
 0x1ba   :  { %125 = vrot.lane.b32.xlu1 %v117_v27, %s3114_s15 }
 0x22c   :  { %v126_v28 = vpop.permute.xlu1 %125 }
 0x22d   :  { %2487 = vmatmul.mubr.msk.f32.vlgmr.msra.gmra.mrb[0].mxu0 %vm127_vm1, %v126_v28  ;;  %2498 = vmatmul.mubr.msk.f32.vlgmr.msra.gmra.mrb[0].mxu1 %vm127_vm1, %v126_v28 }
 0x22e   :  { %2762 = vmatpush3.bf16.msra.mxu0 %v3238_v15  ;;  %2774 = vmatpush3.bf16.msra.mxu1 %v3243_v19 }
 0x22f   :  { %2763 = vmatprep.subr.bf16.mxu0 %v3115_v14  ;;  %2775 = vmatprep.subr.bf16.mxu1 %v3115_v14 }
 0x230   :  { %2508 = vmatprep.mubr.msk.f32.mxu0 %vm3116_vm0, %v3117_v22  ;;  %2530 = vmatprep.mubr.msk.f32.mxu1 %vm3116_vm0, %v3117_v22 }
 0x232   :  { %2765 = vmatpush3.bf16.msra.mxu0 %v3256_v23  ;;  %2777 = vmatpush3.bf16.msra.mxu1 %v3260_v24 }
 0x233   :  { %2766 = vmatprep.subr.bf16.mxu0 %v3115_v14  ;;  %2778 = vmatprep.subr.bf16.mxu1 %v3115_v14 }
 0x300   :  { %v196_v31 = vpop.f32.mrb[0].mxu0  ;;  %v295_v32 = vpop.f32.mrb[0].mxu1 }
 0x301   :  { %v197_v33 = vadd.f32 %v3286_v29, %v196_v31  ;;  %v299_v34 = vadd.f32 %v295_v32, %v228_v30  ;;  %v2488_v35 = vpop.f32.mrb[1].mxu0  ;;  %v2499_v36 = vpop.f32.mrb[1].mxu1 }
 0x303   :  { %2933 = vtanh.f32 %v197_v33  ;;  %v200_v39 = vmul.f32 0.5, %v197_v33  ;;  %v300_v40 = vmul.f32 0.5, %v299_v34 }
 0x304   :  { %2935 = vtanh.f32 %v299_v34 }
 0x305   :  { %2937 = vtanh.f32 %v200_v39 }
 0x306   :  { %2939 = vtanh.f32 %v300_v40 }
 0x30d   :  { %v2934_v37 = vpop.eup %2933 }
 0x30e   :  { %v2936_v38 = vpop.eup %2935  ;;  %207 = vrot.lane.b32.xlu1 %v2934_v37, %s3113_s14 }
 0x30f   :  { %307 = vrot.lane.b32.xlu0 %v2936_v38, %s3113_s14  ;;  %v2938_v41 = vpop.eup %2937 }
 0x310   :  { %v2940_v42 = vpop.eup %2939  ;;  %v202_v43 = vmul.f32 0.5, %v2938_v41 }
 0x311   :  { %v302_v44 = vmul.f32 0.5, %v2940_v42 }
 0x312   :  { %v203_v45 = vadd.f32 0.5, %v202_v43 }
 0x313   :  { %v303_v47 = vadd.f32 0.5, %v302_v44 }
 0x314   :  { %v205_v51 = vmul.f32 0.0, %v203_v45 }
 0x315   :  { %v305_v53 = vmul.f32 %v303_v47, %v3230_v10 }
 0x380   :  { %v208_v46 = vpop.permute.xlu1 %207 }
 0x381   :  { %v210_v48 = vmul.f32 %v208_v46, %v203_v45  ;;  %v308_v49 = vpop.permute.xlu0 %307  ;;  %v497_v46 = vstv %s496_s12 }
 0x382   :  { %v310_v50 = vmul.f32 %v308_v49, %v303_v47  ;;  %vm498_vm3 = vcmp.eq.s32.totalorder %v497_v46, 1 }
 0x383   :  { %212 = vrot.lane.b32.xlu1 %v210_v48, %s3114_s15 }
 0x384   :  { %312 = vrot.lane.b32.xlu0 %v310_v50, %s3114_s15 }
 0x3f5   :  { %v213_v52 = vpop.permute.xlu1 %212 }
 0x3f6   :  { %v3294_v54 = vadd.f32 %v213_v52, %v205_v51  ;;  %v313_v55 = vpop.permute.xlu0 %312 }
 0x3f7   :  { %v3296_v56 = vadd.f32 %v313_v55, %v305_v53  ;;  %v774_v53 = vld [vmem:[#allocation4 + $0x18] sm:$0xff] }
 0x3f8   :  { %2941 = vtanh.f32 %v3294_v54 }
 0x3f9   :  { %2943 = vtanh.f32 %v3296_v56 }
 0x402   :  { %v2942_v57 = vpop.eup %2941 }
 0x403   :  { %v2944_v58 = vpop.eup %2943  ;;  %218 = vrot.lane.b32.xlu1 %v2942_v57, %s3113_s14 }
 0x404   :  { %318 = vrot.lane.b32.xlu0 %v2944_v58, %s3113_s14 }
 0x475   :  { %v219_v59 = vpop.permute.xlu1 %218 }
 0x476   :  { %v3302_v60 = vmul.f32 %v219_v59, %v203_v45  ;;  %v319_v61 = vpop.permute.xlu0 %318  ;;  %v224_v45 = vstv %s223_s11 }
 0x477   :  { %v321_v62 = vmul.f32 %v319_v61, %v303_v47  ;;  %vm225_vm2 = vcmp.eq.s32.totalorder %v224_v45, 1 }
 0x478   :  { %398 = vrot.lane.b32.xlu1 %v3302_v60, %s3114_s15  ;;  %v226_v49 = vsel %vm225_vm2, %v3302_v60, 0.0 }
 0x479   :  { %323 = vrot.lane.b32.xlu0 %v321_v62, %s3114_s15 }
 0x4ea   :  { %v399_v6 = vpop.permute.xlu1 %398 }
 0x4eb   :  { %v324_v4 = vpop.permute.xlu0 %323 }
 0x4ec   :  { %2509 = vmatmul.mubr.msk.f32.vlgmr.msra.gmra.mrb[2].mxu0 %vm127_vm1, %v324_v4  ;;  %2531 = vmatmul.mubr.msk.f32.vlgmr.msra.gmra.mrb[2].mxu1 %vm127_vm1, %v324_v4 }
 0x4ed   :  { %2768 = vmatpush3.bf16.msra.mxu0 %v3313_v1  ;;  %2519 = vmatprep.mubr.msk.f32.mxu0 %vm3116_vm0, %v3117_v22 }
 0x4ee   :  { %2769 = vmatprep.subr.bf16.mxu0 %v3115_v14  ;;  %2780 = vmatpush3.bf16.msra.mxu1 %v3238_v15 }
 0x4ef   :  { %2781 = vmatprep.subr.bf16.mxu1 %v3115_v14  ;;  %2541 = vmatprep.mubr.msk.f32.mxu1 %vm3116_vm0, %v3117_v22 }
 0x4f1   :  { %2771 = vmatpush3.bf16.msra.mxu0 %v3324_v5 }
 0x4f2   :  { %2790 = vmatprep.subr.bf16.mxu0 %v3115_v14  ;;  %2783 = vmatpush3.bf16.msra.mxu1 %v3256_v23 }
 0x4f3   :  { %2784 = vmatprep.subr.bf16.mxu1 %v3115_v14 }
 0x4f4   :  { %2520 = vmatmul.mubr.msk.f32.vlgmr.msra.gmra.mrb[2].mxu0 %vm127_vm1, %v399_v6 }
 0x4f5   :  { %2792 = vmatpush3.bf16.msra.mxu0 %v3243_v19  ;;  %2563 = vmatprep.mubr.msk.f32.mxu0 %vm3116_vm0, %v3117_v22 }
 0x4f6   :  { %2793 = vmatprep.subr.bf16.mxu0 %v3115_v14 }
 0x4f9   :  { %2795 = vmatpush3.bf16.msra.mxu0 %v3260_v24 }
 0x4fa   :  { %2796 = vmatprep.subr.bf16.mxu0 %v3115_v14 }
 0x5bf   :  { %v568_v8 = vpop.f32.mrb[2].mxu1 }
 0x5c0   :  { %v572_v9 = vadd.f32 %v568_v8, %v501_v7  ;;  %v2532_v10 = vpop.f32.mrb[3].mxu1 }
 0x5c2   :  { %2945 = vtanh.f32 %v572_v9  ;;  %v573_v18 = vmul.f32 0.5, %v572_v9 }
 0x5c7   :  { %v468_v11 = vpop.f32.mrb[2].mxu0 }
 0x5c8   :  { %v2895_v12 = vadd.f32 %v3286_v29, %v468_v11  ;;  %v2521_v13 = vpop.f32.mrb[3].mxu0 }
 0x5ca   :  { %2947 = vtanh.f32 %v2895_v12  ;;  %v473_v20 = vmul.f32 0.5, %v2895_v12 }
 0x5cb   :  { %2949 = vtanh.f32 %v573_v18 }
 0x5cc   :  { %v2946_v16 = vpop.eup %2945  ;;  %2951 = vtanh.f32 %v473_v20 }
 0x5cd   :  { %580 = vrot.lane.b32.xlu0 %v2946_v16, %s3113_s14 }
 0x5d4   :  { %v2948_v17 = vpop.eup %2947 }
 0x5d5   :  { %480 = vrot.lane.b32.xlu1 %v2948_v17, %s3113_s14  ;;  %v2950_v21 = vpop.eup %2949 }
 0x5d6   :  { %v575_v25 = vmul.f32 0.5, %v2950_v21  ;;  %v2952_v27 = vpop.eup %2951 }
 0x5d7   :  { %v475_v31 = vmul.f32 0.5, %v2952_v27 }
 0x5d8   :  { %v576_v26 = vadd.f32 0.5, %v575_v25 }
 0x5d9   :  { %v476_v32 = vadd.f32 0.5, %v475_v31 }
 0x5da   :  { %v578_v35 = vmul.f32 %v576_v26, %v3296_v56 }
 0x5db   :  { %v478_v38 = vmul.f32 %v476_v32, %v3294_v54 }
 0x63f   :  { %v581_v28 = vpop.permute.xlu0 %580 }
 0x640   :  { %v583_v30 = vmul.f32 %v581_v28, %v576_v26  ;;  %v770_v28 = vstv %s769_s13 }
 0x641   :  { %vm3406_vm4 = vcmp.eq.s32.totalorder %v770_v28, 1 }
 0x642   :  { %585 = vrot.lane.b32.xlu0 %v583_v30, %s3114_s15 }
 0x647   :  { %v481_v33 = vpop.permute.xlu1 %480 }
 0x648   :  { %v483_v34 = vmul.f32 %v481_v33, %v476_v32 }
 0x64a   :  { %485 = vrot.lane.b32.xlu1 %v483_v34, %s3114_s15 }
 0x6b4   :  { %v586_v36 = vpop.permute.xlu0 %585 }
 0x6b5   :  { %v3350_v37 = vadd.f32 %v586_v36, %v578_v35  ;;  %v1047_v36 = vld [vmem:[#allocation4 + $0x20] sm:$0xff] }
 0x6b7   :  { %2953 = vtanh.f32 %v3350_v37 }
 0x6bc   :  { %v486_v39 = vpop.permute.xlu1 %485 }
 0x6bd   :  { %v3354_v40 = vadd.f32 %v486_v39, %v478_v38 }
 0x6bf   :  { %2955 = vtanh.f32 %v3354_v40 }
 0x6c1   :  { %v2954_v41 = vpop.eup %2953 }
 0x6c2   :  { %591 = vrot.lane.b32.xlu0 %v2954_v41, %s3113_s14 }
 0x6c9   :  { %v2956_v42 = vpop.eup %2955 }
 0x6ca   :  { %491 = vrot.lane.b32.xlu1 %v2956_v42, %s3113_s14 }
 0x734   :  { %v592_v43 = vpop.permute.xlu0 %591 }
 0x735   :  { %v594_v44 = vmul.f32 %v592_v43, %v576_v26 }
 0x737   :  { %596 = vrot.lane.b32.xlu0 %v594_v44, %s3114_s15 }
 0x73c   :  { %v492_v47 = vpop.permute.xlu1 %491 }
 0x73d   :  { %v494_v48 = vmul.f32 %v492_v47, %v476_v32 }
 0x73f   :  { %v3365_v50 = vsel %vm498_vm3, %v494_v48, %v226_v49  ;;  %671 = vrot.lane.b32.xlu1 %v494_v48, %s3114_s15 }
 0x7a9   :  { %v597_v51 = vpop.permute.xlu0 %596 }
 0x7aa   :  { %2542 = vmatmul.mubr.msk.f32.vlgmr.msra.gmra.mrb[4].mxu1 %vm127_vm1, %v597_v51  ;;  %2564 = vmatmul.mubr.msk.f32.vlgmr.msra.gmra.mrb[4].mxu0 %vm127_vm1, %v597_v51 }
 0x7ab   :  { %2786 = vmatpush3.bf16.msra.mxu1 %v3313_v1  ;;  %2552 = vmatprep.mubr.msk.f32.mxu1 %vm3116_vm0, %v3117_v22 }
 0x7ac   :  { %2787 = vmatprep.subr.bf16.mxu1 %v3115_v14  ;;  %2798 = vmatpush3.bf16.msra.mxu0 %v3238_v15 }
 0x7ad   :  { %2799 = vmatprep.subr.bf16.mxu0 %v3115_v14  ;;  %2574 = vmatprep.mubr.msk.f32.mxu0 %vm3116_vm0, %v3117_v22 }
 0x7af   :  { %2789 = vmatpush3.bf16.msra.mxu1 %v3324_v5 }
 0x7b0   :  { %2808 = vmatprep.subr.bf16.mxu1 %v3115_v14  ;;  %2801 = vmatpush3.bf16.msra.mxu0 %v3256_v23 }
 0x7b1   :  { %v672_v52 = vpop.permute.xlu1 %671  ;;  %2802 = vmatprep.subr.bf16.mxu0 %v3115_v14 }
 0x7b2   :  { %2553 = vmatmul.mubr.msk.f32.vlgmr.msra.gmra.mrb[4].mxu1 %vm127_vm1, %v672_v52 }
 0x7b3   :  { %2810 = vmatpush3.bf16.msra.mxu1 %v3243_v19  ;;  %2596 = vmatprep.mubr.msk.f32.mxu1 %vm3116_vm0, %v3117_v22 }
 0x7b4   :  { %2811 = vmatprep.subr.bf16.mxu1 %v3115_v14 }
 0x7b7   :  { %2813 = vmatpush3.bf16.msra.mxu1 %v3260_v24 }
 0x7b8   :  { %2814 = vmatprep.subr.bf16.mxu1 %v3115_v14 }
 0x87d   :  { %v841_v54 = vpop.f32.mrb[4].mxu0 }
 0x87e   :  { %v845_v55 = vadd.f32 %v841_v54, %v774_v53  ;;  %v2565_v56 = vpop.f32.mrb[5].mxu0 }
 0x880   :  { %2957 = vtanh.f32 %v845_v55  ;;  %v846_v62 = vmul.f32 0.5, %v845_v55 }
 0x885   :  { %v741_v57 = vpop.f32.mrb[4].mxu1 }
 0x886   :  { %v2896_v58 = vadd.f32 %v3286_v29, %v741_v57  ;;  %v2554_v59 = vpop.f32.mrb[5].mxu1 }
 0x888   :  { %2959 = vtanh.f32 %v2896_v58  ;;  %v746_v63 = vmul.f32 0.5, %v2896_v58 }
 0x889   :  { %2961 = vtanh.f32 %v846_v62 }
 0x88a   :  { %v2958_v60 = vpop.eup %2957  ;;  %2963 = vtanh.f32 %v746_v63 }
 0x88b   :  { %853 = vrot.lane.b32.xlu0 %v2958_v60, %s3113_s14 }
 0x892   :  { %v2960_v61 = vpop.eup %2959 }
 0x893   :  { %753 = vrot.lane.b32.xlu1 %v2960_v61, %s3113_s14  ;;  %v2962_v0 = vpop.eup %2961 }
 0x894   :  { %v848_v2 = vmul.f32 0.5, %v2962_v0  ;;  %v2964_v4 = vpop.eup %2963 }
 0x895   :  { %v748_v8 = vmul.f32 0.5, %v2964_v4 }
 0x896   :  { %v849_v3 = vadd.f32 0.5, %v848_v2 }
 0x897   :  { %v749_v9 = vadd.f32 0.5, %v748_v8 }
 0x898   :  { %v851_v12 = vmul.f32 %v849_v3, %v3350_v37 }
 0x899   :  { %v751_v17 = vmul.f32 %v749_v9, %v3354_v40 }
 0x8fd   :  { %v854_v6 = vpop.permute.xlu0 %853 }
 0x8fe   :  { %v856_v7 = vmul.f32 %v854_v6, %v849_v3  ;;  %v1043_v6 = vstv %s1042_s1 }
 0x8ff   :  { %vm1044_vm5 = vcmp.eq.s32.totalorder %v1043_v6, 1 }
 0x900   :  { %858 = vrot.lane.b32.xlu0 %v856_v7, %s3114_s15 }
 0x905   :  { %v754_v10 = vpop.permute.xlu1 %753 }
 0x906   :  { %v756_v11 = vmul.f32 %v754_v10, %v749_v9 }
 0x908   :  { %758 = vrot.lane.b32.xlu1 %v756_v11, %s3114_s15  ;;  %v1320_v11 = vld [vmem:[#allocation4 + $0x28] sm:$0xff] }
 0x972   :  { %v859_v13 = vpop.permute.xlu0 %858 }
 0x973   :  { %v3395_v16 = vadd.f32 %v859_v13, %v851_v12 }
 0x975   :  { %2965 = vtanh.f32 %v3395_v16 }
 0x97a   :  { %v759_v18 = vpop.permute.xlu1 %758 }
 0x97b   :  { %v3399_v20 = vadd.f32 %v759_v18, %v751_v17 }
 0x97d   :  { %2967 = vtanh.f32 %v3399_v20 }
 0x97f   :  { %v2966_v21 = vpop.eup %2965 }
 0x980   :  { %864 = vrot.lane.b32.xlu0 %v2966_v21, %s3113_s14 }
 0x987   :  { %v2968_v25 = vpop.eup %2967 }
 0x988   :  { %764 = vrot.lane.b32.xlu1 %v2968_v25, %s3113_s14 }
 0x9f2   :  { %v865_v26 = vpop.permute.xlu0 %864 }
 0x9f3   :  { %v867_v27 = vmul.f32 %v865_v26, %v849_v3 }
 0x9f5   :  { %869 = vrot.lane.b32.xlu0 %v867_v27, %s3114_s15 }
 0x9fa   :  { %v765_v30 = vpop.permute.xlu1 %764 }
 0x9fb   :  { %v3410_v32 = vmul.f32 %v765_v30, %v749_v9 }
 0x9fd   :  { %v772_v33 = vsel %vm3406_vm4, %v3410_v32, %v3365_v50  ;;  %944 = vrot.lane.b32.xlu1 %v3410_v32, %s3114_s15 }
 0xa67   :  { %v870_v34 = vpop.permute.xlu0 %869 }
 0xa68   :  { %2575 = vmatmul.mubr.msk.f32.vlgmr.msra.gmra.mrb[6].mxu0 %vm127_vm1, %v870_v34  ;;  %2597 = vmatmul.mubr.msk.f32.vlgmr.msra.gmra.mrb[6].mxu1 %vm127_vm1, %v870_v34 }
 0xa69   :  { %2804 = vmatpush3.bf16.msra.mxu0 %v3313_v1  ;;  %2585 = vmatprep.mubr.msk.f32.mxu0 %vm3116_vm0, %v3117_v22 }
 0xa6a   :  { %2805 = vmatprep.subr.bf16.mxu0 %v3115_v14  ;;  %2816 = vmatpush3.bf16.msra.mxu1 %v3238_v15 }
 0xa6b   :  { %2817 = vmatprep.subr.bf16.mxu1 %v3115_v14  ;;  %2607 = vmatprep.mubr.msk.f32.mxu1 %vm3116_vm0, %v3117_v22 }
 0xa6d   :  { %2807 = vmatpush3.bf16.msra.mxu0 %v3324_v5 }
 0xa6e   :  { %2826 = vmatprep.subr.bf16.mxu0 %v3115_v14  ;;  %2819 = vmatpush3.bf16.msra.mxu1 %v3256_v23 }
 0xa6f   :  { %v945_v35 = vpop.permute.xlu1 %944  ;;  %2820 = vmatprep.subr.bf16.mxu1 %v3115_v14 }
 0xa70   :  { %2586 = vmatmul.mubr.msk.f32.vlgmr.msra.gmra.mrb[6].mxu0 %vm127_vm1, %v945_v35 }
 0xa71   :  { %2828 = vmatpush3.bf16.msra.mxu0 %v3243_v19  ;;  %2629 = vmatprep.mubr.msk.f32.mxu0 %vm3116_vm0, %v3117_v22 }
 0xa72   :  { %2829 = vmatprep.subr.bf16.mxu0 %v3115_v14 }
 0xa75   :  { %2831 = vmatpush3.bf16.msra.mxu0 %v3260_v24 }
 0xa76   :  { %2832 = vmatprep.subr.bf16.mxu0 %v3115_v14 }
 0xb3b   :  { %v1114_v37 = vpop.f32.mrb[6].mxu1 }
 0xb3c   :  { %v1118_v38 = vadd.f32 %v1114_v37, %v1047_v36  ;;  %v2598_v39 = vpop.f32.mrb[7].mxu1 }
 0xb3e   :  { %2969 = vtanh.f32 %v1118_v38  ;;  %v1119_v45 = vmul.f32 0.5, %v1118_v38 }
 0xb43   :  { %v1014_v40 = vpop.f32.mrb[6].mxu0 }
 0xb44   :  { %v2897_v41 = vadd.f32 %v3286_v29, %v1014_v40  ;;  %v2587_v42 = vpop.f32.mrb[7].mxu0 }
 0xb46   :  { %2971 = vtanh.f32 %v2897_v41  ;;  %v1019_v46 = vmul.f32 0.5, %v2897_v41 }
 0xb47   :  { %2973 = vtanh.f32 %v1119_v45 }
 0xb48   :  { %v2970_v43 = vpop.eup %2969  ;;  %2975 = vtanh.f32 %v1019_v46 }
 0xb49   :  { %1126 = vrot.lane.b32.xlu0 %v2970_v43, %s3113_s14 }
 0xb50   :  { %v2972_v44 = vpop.eup %2971 }
 0xb51   :  { %1026 = vrot.lane.b32.xlu1 %v2972_v44, %s3113_s14  ;;  %v2974_v47 = vpop.eup %2973 }
 0xb52   :  { %v1121_v48 = vmul.f32 0.5, %v2974_v47  ;;  %v2976_v51 = vpop.eup %2975 }
 0xb53   :  { %v1021_v54 = vmul.f32 0.5, %v2976_v51 }
 0xb54   :  { %v1122_v49 = vadd.f32 0.5, %v1121_v48 }
 0xb55   :  { %v1022_v55 = vadd.f32 0.5, %v1021_v54 }
 0xb56   :  { %v1124_v58 = vmul.f32 %v1122_v49, %v3395_v16 }
 0xb57   :  { %v1024_v61 = vmul.f32 %v1022_v55, %v3399_v20 }
 0xbbb   :  { %v1127_v52 = vpop.permute.xlu0 %1126 }
 0xbbc   :  { %v1129_v53 = vmul.f32 %v1127_v52, %v1122_v49 }
 0xbbe   :  { %1131 = vrot.lane.b32.xlu0 %v1129_v53, %s3114_s15 }
 0xbc3   :  { %v1027_v56 = vpop.permute.xlu1 %1026 }
 0xbc4   :  { %v1029_v57 = vmul.f32 %v1027_v56, %v1022_v55 }
 0xbc6   :  { %1031 = vrot.lane.b32.xlu1 %v1029_v57, %s3114_s15  ;;  %v1593_v57 = vld [vmem:[#allocation4 + $0x30] sm:$0xff] }
 0xc30   :  { %v1132_v59 = vpop.permute.xlu0 %1131 }
 0xc31   :  { %v3445_v60 = vadd.f32 %v1132_v59, %v1124_v58 }
 0xc33   :  { %2977 = vtanh.f32 %v3445_v60 }
 0xc38   :  { %v1032_v62 = vpop.permute.xlu1 %1031 }
 0xc39   :  { %v3449_v63 = vadd.f32 %v1032_v62, %v1024_v61 }
 0xc3b   :  { %2979 = vtanh.f32 %v3449_v63 }
 0xc3d   :  { %v2978_v0 = vpop.eup %2977 }
 0xc3e   :  { %1137 = vrot.lane.b32.xlu0 %v2978_v0, %s3113_s14 }
 0xc45   :  { %v2980_v2 = vpop.eup %2979 }
 0xc46   :  { %1037 = vrot.lane.b32.xlu1 %v2980_v2, %s3113_s14 }
 0xcb0   :  { %v1138_v3 = vpop.permute.xlu0 %1137 }
 0xcb1   :  { %v1140_v4 = vmul.f32 %v1138_v3, %v1122_v49  ;;  %v1316_v49 = vstv %s1315_s21 }
 0xcb2   :  { %vm3502_vm6 = vcmp.eq.s32.totalorder %v1316_v49, 1 }
 0xcb3   :  { %1142 = vrot.lane.b32.xlu0 %v1140_v4, %s3114_s15 }
 0xcb8   :  { %v1038_v7 = vpop.permute.xlu1 %1037 }
 0xcb9   :  { %v1040_v8 = vmul.f32 %v1038_v7, %v1022_v55 }
 0xcbb   :  { %v3461_v9 = vsel %vm1044_vm5, %v1040_v8, %v772_v33  ;;  %1217 = vrot.lane.b32.xlu1 %v1040_v8, %s3114_s15 }
 0xd25   :  { %v1143_v10 = vpop.permute.xlu0 %1142 }
 0xd26   :  { %2608 = vmatmul.mubr.msk.f32.vlgmr.msra.gmra.mrb[8].mxu1 %vm127_vm1, %v1143_v10  ;;  %2630 = vmatmul.mubr.msk.f32.vlgmr.msra.gmra.mrb[8].mxu0 %vm127_vm1, %v1143_v10 }
 0xd27   :  { %2822 = vmatpush3.bf16.msra.mxu1 %v3313_v1  ;;  %2618 = vmatprep.mubr.msk.f32.mxu1 %vm3116_vm0, %v3117_v22 }
 0xd28   :  { %2823 = vmatprep.subr.bf16.mxu1 %v3115_v14  ;;  %2834 = vmatpush3.bf16.msra.mxu0 %v3238_v15 }
 0xd29   :  { %2835 = vmatprep.subr.bf16.mxu0 %v3115_v14  ;;  %2640 = vmatprep.mubr.msk.f32.mxu0 %vm3116_vm0, %v3117_v22 }
 0xd2b   :  { %2825 = vmatpush3.bf16.msra.mxu1 %v3324_v5 }
 0xd2c   :  { %2844 = vmatprep.subr.bf16.mxu1 %v3115_v14  ;;  %2837 = vmatpush3.bf16.msra.mxu0 %v3256_v23 }
 0xd2d   :  { %v1218_v50 = vpop.permute.xlu1 %1217  ;;  %2838 = vmatprep.subr.bf16.mxu0 %v3115_v14 }
 0xd2e   :  { %2619 = vmatmul.mubr.msk.f32.vlgmr.msra.gmra.mrb[8].mxu1 %vm127_vm1, %v1218_v50 }
 0xd2f   :  { %2846 = vmatpush3.bf16.msra.mxu1 %v3243_v19  ;;  %2662 = vmatprep.mubr.msk.f32.mxu1 %vm3116_vm0, %v3117_v22 }
 0xd30   :  { %2847 = vmatprep.subr.bf16.mxu1 %v3115_v14 }
 0xd33   :  { %2849 = vmatpush3.bf16.msra.mxu1 %v3260_v24 }
 0xd34   :  { %2850 = vmatprep.subr.bf16.mxu1 %v3115_v14 }
 0xdf9   :  { %v1387_v12 = vpop.f32.mrb[8].mxu0 }
 0xdfa   :  { %v1391_v13 = vadd.f32 %v1387_v12, %v1320_v11  ;;  %v2631_v16 = vpop.f32.mrb[9].mxu0 }
 0xdfc   :  { %2981 = vtanh.f32 %v1391_v13  ;;  %v1392_v26 = vmul.f32 0.5, %v1391_v13 }
 0xe01   :  { %v1287_v17 = vpop.f32.mrb[8].mxu1 }
 0xe02   :  { %v2898_v18 = vadd.f32 %v3286_v29, %v1287_v17  ;;  %v2620_v20 = vpop.f32.mrb[9].mxu1 }
 0xe04   :  { %2983 = vtanh.f32 %v2898_v18  ;;  %v1292_v27 = vmul.f32 0.5, %v2898_v18 }
 0xe05   :  { %2985 = vtanh.f32 %v1392_v26 }
 0xe06   :  { %v2982_v21 = vpop.eup %2981  ;;  %2987 = vtanh.f32 %v1292_v27 }
 0xe07   :  { %1399 = vrot.lane.b32.xlu0 %v2982_v21, %s3113_s14 }
 0xe0e   :  { %v2984_v25 = vpop.eup %2983 }
 0xe0f   :  { %1299 = vrot.lane.b32.xlu1 %v2984_v25, %s3113_s14  ;;  %v2986_v28 = vpop.eup %2985 }
 0xe10   :  { %v1394_v30 = vmul.f32 0.5, %v2986_v28  ;;  %v2988_v32 = vpop.eup %2987 }
 0xe11   :  { %v1294_v35 = vmul.f32 0.5, %v2988_v32 }
 0xe12   :  { %v1395_v31 = vadd.f32 0.5, %v1394_v30 }
 0xe13   :  { %v1295_v36 = vadd.f32 0.5, %v1294_v35 }
 0xe14   :  { %v1397_v39 = vmul.f32 %v1395_v31, %v3445_v60 }
 0xe15   :  { %v1297_v42 = vmul.f32 %v1295_v36, %v3449_v63 }
 0xe79   :  { %v1400_v33 = vpop.permute.xlu0 %1399 }
 0xe7a   :  { %v1402_v34 = vmul.f32 %v1400_v33, %v1395_v31 }
 0xe7c   :  { %1404 = vrot.lane.b32.xlu0 %v1402_v34, %s3114_s15 }
 0xe81   :  { %v1300_v37 = vpop.permute.xlu1 %1299 }
 0xe82   :  { %v1302_v38 = vmul.f32 %v1300_v37, %v1295_v36 }
 0xe84   :  { %1304 = vrot.lane.b32.xlu1 %v1302_v38, %s3114_s15 }
 0xeee   :  { %v1405_v40 = vpop.permute.xlu0 %1404 }
 0xeef   :  { %v3491_v41 = vadd.f32 %v1405_v40, %v1397_v39 }
 0xef1   :  { %2989 = vtanh.f32 %v3491_v41 }
 0xef6   :  { %v1305_v43 = vpop.permute.xlu1 %1304 }
 0xef7   :  { %v3495_v44 = vadd.f32 %v1305_v43, %v1297_v42 }
 0xef9   :  { %2991 = vtanh.f32 %v3495_v44 }
 0xefb   :  { %v2990_v45 = vpop.eup %2989 }
 0xefc   :  { %1410 = vrot.lane.b32.xlu0 %v2990_v45, %s3113_s14 }
 0xf03   :  { %v2992_v46 = vpop.eup %2991 }
 0xf04   :  { %1310 = vrot.lane.b32.xlu1 %v2992_v46, %s3113_s14 }
 0xf6e   :  { %v1411_v47 = vpop.permute.xlu0 %1410 }
 0xf6f   :  { %v1413_v48 = vmul.f32 %v1411_v47, %v1395_v31  ;;  %v1589_v31 = vstv %s1588_s6 }
 0xf70   :  { %vm1590_vm7 = vcmp.eq.s32.totalorder %v1589_v31, 1 }
 0xf71   :  { %1415 = vrot.lane.b32.xlu0 %v1413_v48, %s3114_s15 }
 0xf76   :  { %v1311_v51 = vpop.permute.xlu1 %1310 }
 0xf77   :  { %v3506_v53 = vmul.f32 %v1311_v51, %v1295_v36 }
 0xf79   :  { %v1318_v54 = vsel %vm3502_vm6, %v3506_v53, %v3461_v9  ;;  %1490 = vrot.lane.b32.xlu1 %v3506_v53, %s3114_s15 }
 0xfe3   :  { %v1416_v55 = vpop.permute.xlu0 %1415 }
 0xfe4   :  { %2641 = vmatmul.mubr.msk.f32.vlgmr.msra.gmra.mrb[10].mxu0 %vm127_vm1, %v1416_v55  ;;  %2663 = vmatmul.mubr.msk.f32.vlgmr.msra.gmra.mrb[10].mxu1 %vm127_vm1, %v1416_v55 }
 0xfe5   :  { %2840 = vmatpush3.bf16.msra.mxu0 %v3313_v1  ;;  %2651 = vmatprep.mubr.msk.f32.mxu0 %vm3116_vm0, %v3117_v22 }
 0xfe6   :  { %2841 = vmatprep.subr.bf16.mxu0 %v3115_v14  ;;  %2852 = vmatpush3.bf16.msra.mxu1 %v3238_v15 }
 0xfe7   :  { %2853 = vmatprep.subr.bf16.mxu1 %v3115_v14  ;;  %2673 = vmatprep.mubr.msk.f32.mxu1 %vm3116_vm0, %v3117_v22 }
 0xfe9   :  { %2843 = vmatpush3.bf16.msra.mxu0 %v3324_v5 }
 0xfea   :  { %2862 = vmatprep.subr.bf16.mxu0 %v3115_v14  ;;  %2855 = vmatpush3.bf16.msra.mxu1 %v3256_v23 }
 0xfeb   :  { %v1491_v56 = vpop.permute.xlu1 %1490  ;;  %2856 = vmatprep.subr.bf16.mxu1 %v3115_v14 }
 0xfec   :  { %2652 = vmatmul.mubr.msk.f32.vlgmr.msra.gmra.mrb[10].mxu0 %vm127_vm1, %v1491_v56 }
 0xfed   :  { %2864 = vmatpush3.bf16.msra.mxu0 %v3243_v19  ;;  %2695 = vmatprep.mubr.msk.f32.mxu0 %vm3116_vm0, %v3117_v22 }
 0xfee   :  { %2865 = vmatprep.subr.bf16.mxu0 %v3115_v14 }
 0xff1   :  { %2867 = vmatpush3.bf16.msra.mxu0 %v3260_v24 }
 0xff2   :  { %2868 = vmatprep.subr.bf16.mxu0 %v3115_v14 }
0x10b7   :  { %v1660_v58 = vpop.f32.mrb[10].mxu1 }
0x10b8   :  { %v1664_v59 = vadd.f32 %v1660_v58, %v1593_v57  ;;  %v2664_v60 = vpop.f32.mrb[11].mxu1 }
0x10ba   :  { %2993 = vtanh.f32 %v1664_v59  ;;  %v1665_v2 = vmul.f32 0.5, %v1664_v59 }
0x10bf   :  { %v1560_v61 = vpop.f32.mrb[10].mxu0 }
0x10c0   :  { %v2899_v62 = vadd.f32 %v3286_v29, %v1560_v61  ;;  %v2653_v63 = vpop.f32.mrb[11].mxu0 }
0x10c2   :  { %2995 = vtanh.f32 %v2899_v62  ;;  %v1565_v24 = vmul.f32 0.5, %v2899_v62 }
0x10c3   :  { %2997 = vtanh.f32 %v1665_v2  ;;  %v1862_v2 = vstv %s1861_s29 }
0x10c4   :  { %v2994_v19 = vpop.eup %2993  ;;  %2999 = vtanh.f32 %v1565_v24  ;;  %vm3588_vm8 = vcmp.eq.s32.totalorder %v1862_v2, 1 }
0x10c5   :  { %1672 = vrot.lane.b32.xlu0 %v2994_v19, %s3113_s14 }
0x10cc   :  { %v2996_v0 = vpop.eup %2995 }
0x10cd   :  { %1572 = vrot.lane.b32.xlu1 %v2996_v0, %s3113_s14  ;;  %v2998_v3 = vpop.eup %2997 }
0x10ce   :  { %v1667_v4 = vmul.f32 0.5, %v2998_v3  ;;  %v3000_v7 = vpop.eup %2999 }
0x10cf   :  { %v1567_v50 = vmul.f32 0.5, %v3000_v7 }
0x10d0   :  { %v1668_v6 = vadd.f32 0.5, %v1667_v4 }
0x10d1   :  { %v1568_v11 = vadd.f32 0.5, %v1567_v50 }
0x10d2   :  { %v1670_v16 = vmul.f32 %v1668_v6, %v3491_v41 }
0x10d3   :  { %v1570_v20 = vmul.f32 %v1568_v11, %v3495_v44 }
0x1137   :  { %v1673_v8 = vpop.permute.xlu0 %1672 }
0x1138   :  { %v1675_v10 = vmul.f32 %v1673_v8, %v1668_v6 }
0x113a   :  { %1677 = vrot.lane.b32.xlu0 %v1675_v10, %s3114_s15 }
0x113f   :  { %v1573_v12 = vpop.permute.xlu1 %1572 }
0x1140   :  { %v1575_v13 = vmul.f32 %v1573_v12, %v1568_v11 }
0x1142   :  { %1577 = vrot.lane.b32.xlu1 %v1575_v13, %s3114_s15 }
0x11ac   :  { %v1678_v17 = vpop.permute.xlu0 %1677 }
0x11ad   :  { %v3541_v18 = vadd.f32 %v1678_v17, %v1670_v16 }
0x11af   :  { %3001 = vtanh.f32 %v3541_v18 }
0x11b4   :  { %v1578_v21 = vpop.permute.xlu1 %1577 }
0x11b5   :  { %v3545_v25 = vadd.f32 %v1578_v21, %v1570_v20 }
0x11b7   :  { %3003 = vtanh.f32 %v3545_v25 }
0x11b9   :  { %v3002_v26 = vpop.eup %3001 }
0x11ba   :  { %1683 = vrot.lane.b32.xlu0 %v3002_v26, %s3113_s14  ;;  %v2139_v26 = vld [vmem:[#allocation8 + $0x8] sm:$0xff] }
0x11c1   :  { %v3004_v27 = vpop.eup %3003 }
0x11c2   :  { %1583 = vrot.lane.b32.xlu1 %v3004_v27, %s3113_s14  ;;  %v2140_v27 = vld [vmem:[#allocation8 + $0x10] sm:$0xff] }
0x122c   :  { %v1684_v28 = vpop.permute.xlu0 %1683 }
0x122d   :  { %v1686_v30 = vmul.f32 %v1684_v28, %v1668_v6 }
0x122f   :  { %1688 = vrot.lane.b32.xlu0 %v1686_v30, %s3114_s15  ;;  %v2141_v30 = vld [vmem:[#allocation8 + $0x18] sm:$0xff] }
0x1230   :  { %v2884_v31 = vpack.c.bf16 %v2141_v30, %v2140_v27 }
0x1234   :  { %v1584_v32 = vpop.permute.xlu1 %1583 }
0x1235   :  { %v1586_v33 = vmul.f32 %v1584_v32, %v1568_v11 }
0x1237   :  { %v3557_v34 = vsel %vm1590_vm7, %v1586_v33, %v1318_v54  ;;  %1763 = vrot.lane.b32.xlu1 %v1586_v33, %s3114_s15  ;;  %v2135_v33 = vstv %s2134_s30 }
0x1238   :  { %vm2136_vm9 = vcmp.eq.s32.totalorder %v2135_v33, 1 }
0x12a1   :  { %v1689_v35 = vpop.permute.xlu0 %1688 }
0x12a2   :  { %2674 = vmatmul.mubr.msk.f32.vlgmr.msra.gmra.mrb[12].mxu1 %vm127_vm1, %v1689_v35  ;;  %2696 = vmatmul.mubr.msk.f32.vlgmr.msra.gmra.mrb[12].mxu0 %vm127_vm1, %v1689_v35 }
0x12a3   :  { %2858 = vmatpush3.bf16.msra.mxu1 %v3313_v1  ;;  %2684 = vmatprep.mubr.msk.f32.mxu1 %vm3116_vm0, %v3117_v22 }
0x12a4   :  { %2859 = vmatprep.subr.bf16.mxu1 %v3115_v14  ;;  %2870 = vmatpush3.bf16.msra.mxu0 %v3238_v15  ;;  %v1866_v15 = vld [vmem:[#allocation4 + $0x38] sm:$0xff] }
0x12a5   :  { %2871 = vmatprep.subr.bf16.mxu0 %v3115_v14  ;;  %2706 = vmatprep.mubr.msk.f32.mxu0 %vm3116_vm0, %v3117_v22 }
0x12a7   :  { %2861 = vmatpush3.bf16.msra.mxu1 %v3324_v5 }
0x12a8   :  { %2873 = vmatpush3.bf16.msra.mxu0 %v3256_v23  ;;  %2880 = vmatprep.subr.bf16.mxu1 %v3115_v14 }
0x12a9   :  { %v1764_v9 = vpop.permute.xlu1 %1763  ;;  %2874 = vmatprep.subr.bf16.mxu0 %v3115_v14 }
0x12aa   :  { %2685 = vmatmul.mubr.msk.f32.vlgmr.msra.gmra.mrb[12].mxu1 %vm127_vm1, %v1764_v9 }
0x12ab   :  { %2728 = vmatprep.mubr.msk.f32.mxu1 %vm3116_vm0, %v3117_v22 }
0x1375   :  { %v1933_v36 = vpop.f32.mrb[12].mxu0 }
0x1376   :  { %v1937_v37 = vadd.f32 %v1933_v36, %v1866_v15  ;;  %v2697_v38 = vpop.f32.mrb[13].mxu0  ;;  %v2225_v15 = vld [vmem:[%s3655_s8] sm:$0xff]  ;;  %v2226_v36 = vld [vmem:[%s3655_s8 + $0x8] sm:$0xff] }
0x1377   :  { %v2227_v38 = vld [vmem:[%s3655_s8 + $0x10] sm:$0xff] }
0x1378   :  { %3005 = vtanh.f32 %v1937_v37  ;;  %v1938_v43 = vmul.f32 0.5, %v1937_v37  ;;  %v2887_v37 = vpack.c.bf16 %v2226_v36, %v2225_v15 }
0x137d   :  { %v1833_v39 = vpop.f32.mrb[12].mxu1 }
0x137e   :  { %v2900_v40 = vadd.f32 %v3286_v29, %v1833_v39  ;;  %v2686_v41 = vpop.f32.mrb[13].mxu1  ;;  %v2228_v39 = vld [vmem:[%s3655_s8 + $0x18] sm:$0xff] }
0x137f   :  { %v2890_v41 = vpack.c.bf16 %v2228_v39, %v2227_v38 }
0x1380   :  { %3007 = vtanh.f32 %v2900_v40  ;;  %v1838_v44 = vmul.f32 0.5, %v2900_v40 }
0x1381   :  { %3009 = vtanh.f32 %v1938_v43 }
0x1382   :  { %v3006_v23 = vpop.eup %3005  ;;  %3011 = vtanh.f32 %v1838_v44  ;;  %v2231_v44 = vld [vmem:[%s3655_s8 + $0x30] sm:$0x3] }
0x1383   :  { %1945 = vrot.lane.b32.xlu0 %v3006_v23, %s3113_s14  ;;  %v2229_v23 = vld [vmem:[%s3655_s8 + $0x20] sm:$0xff] }
0x138a   :  { %v3008_v42 = vpop.eup %3007 }
0x138b   :  { %1845 = vrot.lane.b32.xlu1 %v3008_v42, %s3113_s14  ;;  %v3010_v45 = vpop.eup %3009  ;;  %v2230_v42 = vld [vmem:[%s3655_s8 + $0x28] sm:$0xff] }
0x138c   :  { %v1940_v46 = vmul.f32 0.5, %v3010_v45  ;;  %v3012_v48 = vpop.eup %3011  ;;  %v2893_v43 = vpack.c.bf16 %v2230_v42, %v2229_v23 }
0x138d   :  { %v1840_v52 = vmul.f32 0.5, %v3012_v48 }
0x138e   :  { %v1941_v47 = vadd.f32 0.5, %v1940_v46 }
0x138f   :  { %v1841_v53 = vadd.f32 0.5, %v1840_v52 }
0x1390   :  { %v1943_v56 = vmul.f32 %v1941_v47, %v3541_v18 }
0x1391   :  { %v1843_v59 = vmul.f32 %v1841_v53, %v3545_v25 }
0x13f5   :  { %v1946_v49 = vpop.permute.xlu0 %1945 }
0x13f6   :  { %v1948_v51 = vmul.f32 %v1946_v49, %v1941_v47 }
0x13f8   :  { %1950 = vrot.lane.b32.xlu0 %v1948_v51, %s3114_s15 }
0x13fd   :  { %v1846_v54 = vpop.permute.xlu1 %1845 }
0x13fe   :  { %v1848_v55 = vmul.f32 %v1846_v54, %v1841_v53 }
0x1400   :  { %1850 = vrot.lane.b32.xlu1 %v1848_v55, %s3114_s15 }
0x146a   :  { %v1951_v57 = vpop.permute.xlu0 %1950 }
0x146b   :  { %v1953_v58 = vadd.f32 %v1951_v57, %v1943_v56 }
0x146d   :  { %3013 = vtanh.f32 %v1953_v58 }
0x1472   :  { %v1851_v60 = vpop.permute.xlu1 %1850 }
0x1473   :  { %v1853_v61 = vadd.f32 %v1851_v60, %v1843_v59 }
0x1475   :  { %3015 = vtanh.f32 %v1853_v61 }
0x1477   :  { %v3014_v62 = vpop.eup %3013 }
0x1478   :  { %1956 = vrot.lane.b32.xlu0 %v3014_v62, %s3113_s14 }
0x147f   :  { %v3016_v63 = vpop.eup %3015 }
0x1480   :  { %1856 = vrot.lane.b32.xlu1 %v3016_v63, %s3113_s14 }
0x14ea   :  { %v1957_v19 = vpop.permute.xlu0 %1956 }
0x14eb   :  { %v1959_v0 = vmul.f32 %v1957_v19, %v1941_v47 }
0x14ed   :  { %1961 = vrot.lane.b32.xlu0 %v1959_v0, %s3114_s15 }
0x14f2   :  { %v1857_v24 = vpop.permute.xlu1 %1856 }
0x14f3   :  { %v1859_v4 = vmul.f32 %v1857_v24, %v1841_v53 }
0x14f5   :  { %2036 = vrot.lane.b32.xlu1 %v1859_v4, %s3114_s15  ;;  %v1864_v6 = vsel %vm3588_vm8, %v1859_v4, %v3557_v34 }
0x155f   :  { %v1962_v7 = vpop.permute.xlu0 %1961 }
0x1560   :  { %2707 = vmatmul.mubr.msk.f32.vlgmr.msra.gmra.mrb[14].mxu0 %vm127_vm1, %v1962_v7 }
0x1561   :  { %2876 = vmatpush3.bf16.msra.mxu0 %v3313_v1  ;;  %2717 = vmatprep.mubr.msk.f32.mxu0 %vm3116_vm0, %v3117_v22 }
0x1562   :  { %2877 = vmatprep.subr.bf16.mxu0 %v3115_v14 }
0x1565   :  { %2879 = vmatpush3.bf16.msra.mxu0 %v3324_v5 }
0x1567   :  { %v2037_v8 = vpop.permute.xlu1 %2036 }
0x1568   :  { %2718 = vmatmul.mubr.msk.f32.vlgmr.msra.gmra.mrb[14].mxu0 %vm127_vm1, %v2037_v8 }
0x163b   :  { %v2106_v10 = vpop.f32.mrb[14].mxu0 }
0x163c   :  { %v2901_v50 = vadd.f32 %v3286_v29, %v2106_v10  ;;  %v2719_v11 = vpop.f32.mrb[15].mxu0  ;;  %v2138_v29 = vld [vmem:[#allocation8] sm:$0xff] }
0x163d   :  { %v2881_v28 = vpack.c.bf16 %v2139_v26, %v2138_v29 }
0x163e   :  { %3017 = vtanh.f32 %v2901_v50  ;;  %v2111_v13 = vmul.f32 0.5, %v2901_v50 }
0x163f   :  { %2882 = vmatpush3.bf16.msra.mxu1 %v2881_v28 }
0x1640   :  { %3019 = vtanh.f32 %v2111_v13  ;;  %2883 = vmatprep.subr.bf16.mxu1 %v3115_v14 }
0x1643   :  { %2885 = vmatpush3.bf16.msra.mxu1 %v2884_v31 }
0x1644   :  { %2886 = vmatprep.subr.bf16.mxu1 %v3115_v14 }
0x1648   :  { %v3018_v12 = vpop.eup %3017 }
0x1649   :  { %2118 = vrot.lane.b32.xlu0 %v3018_v12, %s3113_s14 }
0x164a   :  { %v3020_v1 = vpop.eup %3019 }
0x164b   :  { %v2113_v16 = vmul.f32 0.5, %v3020_v1 }
0x164d   :  { %v2114_v17 = vadd.f32 0.5, %v2113_v16 }
0x164f   :  { %v2116_v5 = vmul.f32 %v2114_v17, %v1853_v61 }
0x16bb   :  { %v2119_v18 = vpop.permute.xlu0 %2118 }
0x16bc   :  { %v2121_v20 = vmul.f32 %v2119_v18, %v2114_v17 }
0x16be   :  { %2123 = vrot.lane.b32.xlu1 %v2121_v20, %s3114_s15 }
0x1730   :  { %v2124_v21 = vpop.permute.xlu1 %2123 }
0x1731   :  { %v2126_v25 = vadd.f32 %v2124_v21, %v2116_v5 }
0x1733   :  { %3021 = vtanh.f32 %v2126_v25 }
0x173d   :  { %v3022_v32 = vpop.eup %3021 }
0x173e   :  { %2129 = vrot.lane.b32.xlu0 %v3022_v32, %s3113_s14 }
0x17b0   :  { %v2130_v34 = vpop.permute.xlu0 %2129 }
0x17b1   :  { %v2132_v35 = vmul.f32 %v2130_v34, %v2114_v17 }
0x17b3   :  { %v2137_v9 = vsel %vm2136_vm9, %v2132_v35, %v1864_v6 }
0x17b4   :  { %2150 = vrot.lane.b32.xlu1 %v2137_v9, %s3114_s15 }
0x1826   :  { %v2151_v40 = vpop.permute.xlu1 %2150 }
0x1827   :  { %2729 = vmatmul.mubr.msk.f32.vlgmr.msra.gmra.mrb[14].mxu1 %vm127_vm1, %v2151_v40 }
0x1828   :  { %2888 = vmatpush3.bf16.msra.mxu1 %v2887_v37  ;;  %2745 = vmatprep.mubr.msk.f32.mxu1 %vm3116_vm0, %v3117_v22 }
0x1829   :  { %2889 = vmatprep.subr.bf16.mxu1 %v3115_v14 }
0x182c   :  { %2891 = vmatpush3.bf16.msra.mxu1 %v2890_v41 }
0x182d   :  { %2892 = vmatprep.subr.bf16.mxu1 %v3115_v14  ;;  %v2350_v14 = vld [vmem:[%s3654_s7] ss:$0 sm:$0xff] }
0x1830   :  { %2894 = vmatpush3.bf16.msra.mxu1 %v2893_v43 }
0x1831   :  { %2743 = vmatprep.subr.mxu1 %v3117_v22  ;;  %v2352_v22 = vld [vmem:[%s3656_s9] ss:$0 sm:$0xff] }
0x1834   :  { %2744 = vmatpush3.msk.msra.mxu1 %vm2243_vm10, %v2231_v44 }
0x18fa   :  { %v2220_v45 = vpop.f32.mrb[14].mxu1 }
0x18fb   :  { %v2221_v46 = vadd.f32 %v2350_v14, %v2220_v45  ;;  %v2730_v47 = vpop.f32.mrb[15].mxu1 }
0x18fd   :  { %v2224_v48 = vmax.f32 %v2221_v46, 0.0 }
0x18ff   :  { %2746 = vmatmul.mubr.msk.f32.vlgmr.msra.gmra.mrb[16].mxu1 %vm2239_vm11, %v2224_v48 }
0x19d2   :  { %v2313_v49 = vpop.f32.mrb[16].mxu1 }
0x19d3   :  { %v2314_v51 = vadd.f32 %v2352_v22, %v2313_v49  ;;  %v2747_v52 = vpop.f32.mrb[17].mxu1 }
0x19d5   :  { %2318 = vst.msk [vmem:[%s3657_s10] sm:$0xff] %vm2317_vm12, %v2314_v51 }
0x19d6   :  { %2323 = vsyncpa [#allocation5], 1 }
0x19d7   :  { %2324 = vsyncpa [#allocation7], 1 }

</bundles_post_ra>
